<compile_context>
chip_gen: v7x
topology: tpu7x:2x2x1
jax: 0.10.0
libtpu: 0.0.40
codegen_flags: <defaults>
</compile_context>

<pallas_src>
import math
import functools

import jax
import jax.numpy as jnp
import numpy as np
from jax.experimental import pallas as pl
from jax.experimental.pallas import tpu as pltpu


# ----------------------------- config -------------------------------------
class GPTConfig:
    def __init__(self, block_size=16, vocab_size=128, n_layer=2, n_head=4,
                 n_embd=128):
        self.block_size = block_size
        self.vocab_size = vocab_size
        self.n_layer = n_layer
        self.n_head = n_head
        self.n_embd = n_embd


# ------------------------- shared math helpers ------------------------------
def _layernorm(x, w, b, eps=1e-5):
    mu = jnp.mean(x, axis=-1, keepdims=True)
    var = jnp.mean((x - mu) ** 2, axis=-1, keepdims=True)
    return (x - mu) * jax.lax.rsqrt(var + eps) * w + b


def _gelu_tanh(x):
    # nn.GELU(approximate='tanh')
    c = math.sqrt(2.0 / math.pi)
    return 0.5 * x * (1.0 + jnp.tanh(c * (x + 0.044715 * x * x * x)))


BF16 = jnp.bfloat16
F32 = jnp.float32
_NEG = -1e30   # finite large-negative mask bias (avoids 0/0 if masks generalize)


# -------------------------- Pallas kernels ---------------------------------
def qkv_kernel(x_ref, ln_w, ln_b, w_ref, b_ref, o_ref):
    """LN1 + fused QKV projection on an (Mt, C) row tile. Output (Mt, 3C) bf16."""
    h = _layernorm(x_ref[...], ln_w[...], ln_b[...])               # f32
    acc = jnp.dot(h.astype(BF16), w_ref[...],
                  preferred_element_type=jnp.float32) + b_ref[...]
    o_ref[...] = acc.astype(o_ref.dtype)


def attn_kernel(q_ref, k_ref, v_ref, o_ref, *, scale):
    """Head-batched causal attention. q/k/v: (G, T, hd) bf16, G = B*H."""
    q = q_ref[...]
    k = k_ref[...]
    v = v_ref[...]
    T = q.shape[1]

    # one batched contraction for all heads (no per-head loop / .T / concat)
    s = jnp.einsum('gqd,gkd->gqk', q, k,
                   preferred_element_type=jnp.float32) * scale     # (G,T,T) f32

    row = jax.lax.broadcasted_iota(jnp.int32, (T, T), 0)
    col = jax.lax.broadcasted_iota(jnp.int32, (T, T), 1)
    s = jnp.where((row >= col)[None, :, :], s, _NEG)

    s = s - jnp.max(s, axis=-1, keepdims=True)
    e = jnp.exp(s)
    denom = jnp.sum(e, axis=-1, keepdims=True)
    p = e * pl.reciprocal(denom, approx=True)                      # EUP divide

    y = jnp.einsum('gqk,gkd->gqd', p.astype(BF16), v,
                   preferred_element_type=jnp.float32)             # (G,T,hd)
    o_ref[...] = y.astype(o_ref.dtype)


def proj_mlp_kernel(x_ref, y_ref, w_ao, b_ao, ln2_w, ln2_b,
                    w_fc, b_fc, w_mo, b_mo, o_ref):
    """attn out-proj + residual + LN2 + MLP(GELU tanh) + residual on (Mt, C)."""
    x = x_ref[...]                                                  # f32 residual
    att = jnp.dot(y_ref[...], w_ao[...],
                  preferred_element_type=jnp.float32) + b_ao[...]
    x = x + att                                                     # residual 1 (f32)

    h = _layernorm(x, ln2_w[...], ln2_b[...])
    u = jnp.dot(h.astype(BF16), w_fc[...],
                preferred_element_type=jnp.float32) + b_fc[...]
    u = _gelu_tanh(u)
    m = jnp.dot(u.astype(BF16), w_mo[...],
                preferred_element_type=jnp.float32) + b_mo[...]
    o_ref[...] = (x + m).astype(o_ref.dtype)                        # residual 2


def head_kernel(x_ref, lnf_w, lnf_b, w_head, o_ref):
    """Final LN + lm_head on an (Mt, C) x (C, Vt) tile."""
    h = _layernorm(x_ref[...], lnf_w[...], lnf_b[...])
    o_ref[...] = jnp.dot(h.astype(BF16), w_head[...],
                         preferred_element_type=jnp.float32)


# -------------------------- pallas_call wrappers -----------------------------
def _cparams(sem):
    return pltpu.CompilerParams(dimension_semantics=sem,
                                vmem_limit_bytes=64 * 1024 * 1024)


def _rep_spec(shape, grid_rank):
    """Full-array block, replicated across every grid axis."""
    zeros = (0,) * len(shape)
    if grid_rank == 1:
        return pl.BlockSpec(shape, lambda i: zeros)
    return pl.BlockSpec(shape, lambda i, j: zeros)


def _row_tile(m):
    # largest power-of-two row tile up to 256 (v6e/v7x MXU-friendly) dividing m
    for t in (256, 128, 64, 32, 16, 8):
        if m % t == 0:
            return t
    return m


def _qkv_call(x, blk):
    M, C = x.shape
    N = blk["w_qkv"].shape[1]
    Mt = _row_tile(M)
    return pl.pallas_call(
        qkv_kernel,
        out_shape=jax.ShapeDtypeStruct((M, N), BF16),
        grid=(M // Mt,),
        in_specs=[pl.BlockSpec((Mt, C), lambda i: (i, 0)),
                  _rep_spec((1, C), 1), _rep_spec((1, C), 1),
                  _rep_spec((C, N), 1), _rep_spec((1, N), 1)],
        out_specs=pl.BlockSpec((Mt, N), lambda i: (i, 0)),
        compiler_params=_cparams(("parallel",)),
    )(x, blk["ln1_w"], blk["ln1_b"], blk["w_qkv"], blk["b_qkv"])


def _attn_call(q, k, v, hd):
    G, T, _ = q.shape
    Gt = G            # single grid step at toy sizes; tile G at real sizes
    scale = 1.0 / math.sqrt(hd)
    kern = functools.partial(attn_kernel, scale=scale)
    spec = pl.BlockSpec((Gt, T, hd), lambda g: (g, 0, 0))
    return pl.pallas_call(
        kern,
        out_shape=jax.ShapeDtypeStruct((G, T, hd), BF16),
        grid=(G // Gt,),
        in_specs=[spec, spec, spec],
        out_specs=spec,
        compiler_params=_cparams(("parallel",)),
    )(q, k, v)


def _proj_mlp_call(x, y, blk):
    M, C = x.shape
    F = blk["w_fc"].shape[1]
    Mt = _row_tile(M)
    return pl.pallas_call(
        proj_mlp_kernel,
        out_shape=jax.ShapeDtypeStruct((M, C), F32),
        grid=(M // Mt,),
        in_specs=[pl.BlockSpec((Mt, C), lambda i: (i, 0)),
                  pl.BlockSpec((Mt, C), lambda i: (i, 0)),
                  _rep_spec((C, C), 1), _rep_spec((1, C), 1),
                  _rep_spec((1, C), 1), _rep_spec((1, C), 1),
                  _rep_spec((C, F), 1), _rep_spec((1, F), 1),
                  _rep_spec((F, C), 1), _rep_spec((1, C), 1)],
        out_specs=pl.BlockSpec((Mt, C), lambda i: (i, 0)),
        compiler_params=_cparams(("parallel",)),
    )(x, y, blk["w_ao"], blk["b_ao"], blk["ln2_w"], blk["ln2_b"],
      blk["w_fc"], blk["b_fc"], blk["w_mo"], blk["b_mo"])


def _head_call(x, lnf_w, lnf_b, w_head):
    M, C = x.shape
    V = w_head.shape[1]
    Mt = _row_tile(M)
    Vt = 128 if V % 128 == 0 else V            # vocab-tiled lm_head
    return pl.pallas_call(
        head_kernel,
        out_shape=jax.ShapeDtypeStruct((M, V), F32),
        grid=(M // Mt, V // Vt),
        in_specs=[pl.BlockSpec((Mt, C), lambda i, j: (i, 0)),
                  _rep_spec((1, C), 2), _rep_spec((1, C), 2),
                  pl.BlockSpec((C, Vt), lambda i, j: (0, j))],
        out_specs=pl.BlockSpec((Mt, Vt), lambda i, j: (i, j)),
        compiler_params=_cparams(("parallel", "parallel")),
    )(x, lnf_w, lnf_b, w_head)


# -------------------------- forward pass -------------------------------------
def _split_heads(t, B, T, H, hd):
    # (B*T, C) -> (B*H, T, hd)   -- XLA glue, once per tensor per layer
    return t.reshape(B, T, H, hd).transpose(0, 2, 1, 3).reshape(B * H, T, hd)


def _merge_heads(y, B, T, H, hd):
    # (B*H, T, hd) -> (B*T, C)
    return y.reshape(B, H, T, hd).transpose(0, 2, 1, 3).reshape(B * T, H * hd)


def run_block(x, blk, B, T, n_head):
    M, C = x.shape
    H = n_head
    hd = C // H
    qkv = _qkv_call(x, blk)                         # (M, 3C) bf16
    q, k, v = jnp.split(qkv, 3, axis=-1)
    y = _attn_call(_split_heads(q, B, T, H, hd),
                   _split_heads(k, B, T, H, hd),
                   _split_heads(v, B, T, H, hd), hd)   # (B*H, T, hd) bf16
    y = _merge_heads(y, B, T, H, hd)                # (M, C) bf16
    return _proj_mlp_call(x, y, blk)                # (M, C) f32


def gpt_forward(idx, params, config):
    """idx: (B, T) int32 token ids -> logits (B, T, vocab_size) f32."""
    B, T = idx.shape
    assert T <= config.block_size
    C = config.n_embd
    # TODO(synk): embedding gather has no clean Pallas equivalent here; done in JAX.
    tok = params["wte"][idx]                        # (B, T, C) f32
    pos = params["wpe"][:T]                         # (T, C)    f32
    x = (tok + pos[None, :, :]).reshape(B * T, C)   # residual stream, f32 rows
    for blk in params["blocks"]:
        x = run_block(x, blk, B, T, config.n_head)
    logits = _head_call(x, params["lnf_w"], params["lnf_b"], params["w_head"])
    return logits.reshape(B, T, config.vocab_size)


# -------------------------- parameter init ----------------------------------
def init_params(key, config):
    C, V, Tmax = config.n_embd, config.vocab_size, config.block_size
    keys = iter(jax.random.split(key, 4 + 8 * config.n_layer))

    def nrm(shape, std=0.02, dtype=F32):
        return (std * jax.random.normal(next(keys), shape, F32)).astype(dtype)

    params = {
        "wte": nrm((V, C)),                       # embeddings / residual in f32
        "wpe": nrm((Tmax, C)),
        "lnf_w": jnp.ones((1, C), F32),
        "lnf_b": jnp.zeros((1, C), F32),
        "w_head": nrm((C, V), dtype=BF16),        # lm_head (no bias), (in, out)
        "blocks": [],
    }
    for _ in range(config.n_layer):
        blk = {
            "ln1_w": jnp.ones((1, C), F32),
            "ln1_b": jnp.zeros((1, C), F32),
            "w_qkv": nrm((C, 3 * C), dtype=BF16),
            "b_qkv": nrm((1, 3 * C)),
            "w_ao": nrm((C, C), dtype=BF16),
            "b_ao": nrm((1, C)),
            "ln2_w": jnp.ones((1, C), F32),
            "ln2_b": jnp.zeros((1, C), F32),
            "w_fc": nrm((C, 4 * C), dtype=BF16),
            "b_fc": nrm((1, 4 * C)),
            "w_mo": nrm((4 * C, C), dtype=BF16),
            "b_mo": nrm((1, C)),
        }
        params["blocks"].append(blk)
    return params


# -------------------------- pure-JAX reference -------------------------------
def _ref_forward(idx, params, config):
    B, T = idx.shape
    C, H = config.n_embd, config.n_head
    hd = C // H
    x = (params["wte"][idx] + params["wpe"][:T][None]).reshape(B * T, C)
    causal = jnp.tril(jnp.ones((T, T), bool))
    for p in params["blocks"]:
        h = _layernorm(x, p["ln1_w"], p["ln1_b"])
        qkv = (jnp.dot(h.astype(BF16), p["w_qkv"],
                       preferred_element_type=jnp.float32)
               + p["b_qkv"]).astype(BF16)
        q, k, v = jnp.split(qkv, 3, axis=-1)

        def heads(t):
            return t.reshape(B, T, H, hd).transpose(0, 2, 1, 3)   # (B,H,T,hd)

        qh, kh, vh = heads(q), heads(k), heads(v)
        s = jnp.einsum('bhqd,bhkd->bhqk', qh, kh,
                       preferred_element_type=jnp.float32) / math.sqrt(hd)
        s = jnp.where(causal[None, None], s, _NEG)
        s = s - jnp.max(s, axis=-1, keepdims=True)
        e = jnp.exp(s)
        pr = e / jnp.sum(e, axis=-1, keepdims=True)
        y = jnp.einsum('bhqk,bhkd->bhqd', pr.astype(BF16), vh,
                       preferred_element_type=jnp.float32)
        y = y.astype(BF16).transpose(0, 2, 1, 3).reshape(B * T, C)

        x = x + (jnp.dot(y, p["w_ao"], preferred_element_type=jnp.float32)
                 + p["b_ao"])
        h2 = _layernorm(x, p["ln2_w"], p["ln2_b"])
        u = _gelu_tanh(jnp.dot(h2.astype(BF16), p["w_fc"],
                               preferred_element_type=jnp.float32) + p["b_fc"])
        m = jnp.dot(u.astype(BF16), p["w_mo"],
                    preferred_element_type=jnp.float32) + p["b_mo"]
        x = x + m
    h = _layernorm(x, params["lnf_w"], params["lnf_b"])
    logits = jnp.dot(h.astype(BF16), params["w_head"],
                     preferred_element_type=jnp.float32)
    return logits.reshape(B, T, config.vocab_size)


# ----------------------------------- main -----------------------------------
if __name__ == "__main__":
    config = GPTConfig(block_size=16, vocab_size=128, n_layer=2, n_head=4,
                       n_embd=128)
    key = jax.random.PRNGKey(0)
    pkey, ikey = jax.random.split(key)
    params = init_params(pkey, config)

    B, T = 2, 8
    idx = jax.random.randint(ikey, (B, T), 0, config.vocab_size,
                             dtype=jnp.int32)

    fwd = jax.jit(lambda i, p: gpt_forward(i, p, config))
    logits = jax.block_until_ready(fwd(idx, params))

    ref = jax.block_until_ready(_ref_forward(idx, params, config))
    np.testing.assert_allclose(np.asarray(logits), np.asarray(ref),
                               rtol=1e-2, atol=1e-2)
    print("KERNEL_OK")
</pallas_src>

<mosaic_0001>
module attributes {stable_mosaic.version = 11 : i64} {
  func.func @qkv_kernel(%arg0: i32, %arg1: memref<16x128xf32, #tpu.memory_space<vmem>>, %arg2: memref<1x128xf32, #tpu.memory_space<vmem>>, %arg3: memref<1x128xf32, #tpu.memory_space<vmem>>, %arg4: memref<128x384xbf16, #tpu.memory_space<vmem>>, %arg5: memref<1x384xf32, #tpu.memory_space<vmem>>, %arg6: memref<16x384xbf16, #tpu.memory_space<vmem>>) attributes {dimension_semantics = [#tpu.dimension_semantics<parallel>], iteration_bounds = array<i64: 1>, scalar_prefetch = 0 : i64, scratch_operands = 0 : i64, tpu.core_type = #tpu.core_type<tc>, window_params = [{transform_indices = @transform_0, window_bounds = array<i64: 16, 128>}, {pipeline_mode = #tpu.pipeline_mode<synchronous>, transform_indices = @transform_1, window_bounds = array<i64: 1, 128>}, {pipeline_mode = #tpu.pipeline_mode<synchronous>, transform_indices = @transform_2, window_bounds = array<i64: 1, 128>}, {pipeline_mode = #tpu.pipeline_mode<synchronous>, transform_indices = @transform_3, window_bounds = array<i64: 128, 384>}, {pipeline_mode = #tpu.pipeline_mode<synchronous>, transform_indices = @transform_4, window_bounds = array<i64: 1, 384>}, {transform_indices = @transform_5, window_bounds = array<i64: 16, 384>}]} {
    %c0 = arith.constant 0 : index
    %c0_0 = arith.constant 0 : index
    %0 = vector.load %arg1[%c0, %c0_0] : memref<16x128xf32, #tpu.memory_space<vmem>>, vector<16x128xf32>
    %c0_1 = arith.constant 0 : index
    %c0_2 = arith.constant 0 : index
    %1 = vector.load %arg2[%c0_1, %c0_2] : memref<1x128xf32, #tpu.memory_space<vmem>>, vector<1x128xf32>
    %c0_3 = arith.constant 0 : index
    %c0_4 = arith.constant 0 : index
    %2 = vector.load %arg3[%c0_3, %c0_4] : memref<1x128xf32, #tpu.memory_space<vmem>>, vector<1x128xf32>
    %cst = arith.constant dense<0.000000e+00> : vector<16xf32>
    %3 = vector.multi_reduction <add>, %0, %cst [1] : vector<16x128xf32> to vector<16xf32>
    %4 = vector.shape_cast %3 : vector<16xf32> to vector<16x1xf32>
    %cst_5 = arith.constant 1.280000e+02 : f32
    %5 = vector.broadcast %cst_5 : f32 to vector<16x1xf32>
    %6 = arith.divf %4, %5 : vector<16x1xf32>
    %7 = vector.broadcast %6 : vector<16x1xf32> to vector<16x128xf32>
    %8 = arith.subf %0, %7 : vector<16x128xf32>
    %9 = arith.mulf %8, %8 : vector<16x128xf32>
    %cst_6 = arith.constant dense<0.000000e+00> : vector<16xf32>
    %10 = vector.multi_reduction <add>, %9, %cst_6 [1] : vector<16x128xf32> to vector<16xf32>
    %11 = vector.shape_cast %10 : vector<16xf32> to vector<16x1xf32>
    %cst_7 = arith.constant 1.280000e+02 : f32
    %12 = vector.broadcast %cst_7 : f32 to vector<16x1xf32>
    %13 = arith.divf %11, %12 : vector<16x1xf32>
    %14 = vector.broadcast %6 : vector<16x1xf32> to vector<16x128xf32>
    %15 = arith.subf %0, %14 : vector<16x128xf32>
    %cst_8 = arith.constant 9.99999974E-6 : f32
    %16 = vector.broadcast %cst_8 : f32 to vector<16x1xf32>
    %17 = arith.addf %13, %16 : vector<16x1xf32>
    %18 = math.rsqrt %17 : vector<16x1xf32>
    %19 = vector.broadcast %18 : vector<16x1xf32> to vector<16x128xf32>
    %20 = arith.mulf %15, %19 : vector<16x128xf32>
    %21 = vector.broadcast %1 : vector<1x128xf32> to vector<16x128xf32>
    %22 = arith.mulf %20, %21 : vector<16x128xf32>
    %23 = vector.broadcast %2 : vector<1x128xf32> to vector<16x128xf32>
    %24 = arith.addf %22, %23 : vector<16x128xf32>
    %25 = arith.truncf %24 : vector<16x128xf32> to vector<16x128xbf16>
    %c0_9 = arith.constant 0 : index
    %c0_10 = arith.constant 0 : index
    %26 = vector.load %arg4[%c0_9, %c0_10] : memref<128x384xbf16, #tpu.memory_space<vmem>>, vector<128x384xbf16>
    %cst_11 = arith.constant dense<0.000000e+00> : vector<16x384xf32>
    %27 = tpu.matmul %25, %26, %cst_11 {dimension_numbers = #tpu.dot_dimension_numbers<[1], [0], [0], [1], [0, 0, 1, 1], [], []>} : vector<16x128xbf16>, vector<128x384xbf16>, vector<16x384xf32> -> vector<16x384xf32>
    %c0_12 = arith.constant 0 : index
    %c0_13 = arith.constant 0 : index
    %28 = vector.load %arg5[%c0_12, %c0_13] : memref<1x384xf32, #tpu.memory_space<vmem>>, vector<1x384xf32>
    %29 = vector.broadcast %28 : vector<1x384xf32> to vector<16x384xf32>
    %30 = arith.addf %27, %29 : vector<16x384xf32>
    %31 = arith.truncf %30 : vector<16x384xf32> to vector<16x384xbf16>
    %c0_14 = arith.constant 0 : index
    %c0_15 = arith.constant 0 : index
    %32 = vector.load %arg6[%c0_14, %c0_15] : memref<16x384xbf16, #tpu.memory_space<vmem>>, vector<16x384xbf16>
    tpu.vector_store %arg6[%c0_14, %c0_15], %31 {strides = array<i32>} : memref<16x384xbf16, #tpu.memory_space<vmem>>, vector<16x384xbf16>,
    return
  }
  func.func @transform_0(%arg0: i32) -> (i32, i32) {
    %c0_i32 = arith.constant 0 : i32
    %c0_i32_0 = arith.constant 0 : i32
    return %arg0, %c0_i32 : i32, i32
  }
  func.func @transform_1(%arg0: i32) -> (i32, i32) {
    %c0_i32 = arith.constant 0 : i32
    %c0_i32_0 = arith.constant 0 : i32
    %c0_i32_1 = arith.constant 0 : i32
    return %c0_i32, %c0_i32_0 : i32, i32
  }
  func.func @transform_2(%arg0: i32) -> (i32, i32) {
    %c0_i32 = arith.constant 0 : i32
    %c0_i32_0 = arith.constant 0 : i32
    %c0_i32_1 = arith.constant 0 : i32
    return %c0_i32, %c0_i32_0 : i32, i32
  }
  func.func @transform_3(%arg0: i32) -> (i32, i32) {
    %c0_i32 = arith.constant 0 : i32
    %c0_i32_0 = arith.constant 0 : i32
    %c0_i32_1 = arith.constant 0 : i32
    return %c0_i32, %c0_i32_0 : i32, i32
  }
  func.func @transform_4(%arg0: i32) -> (i32, i32) {
    %c0_i32 = arith.constant 0 : i32
    %c0_i32_0 = arith.constant 0 : i32
    %c0_i32_1 = arith.constant 0 : i32
    return %c0_i32, %c0_i32_0 : i32, i32
  }
  func.func @transform_5(%arg0: i32) -> (i32, i32) {
    %c0_i32 = arith.constant 0 : i32
    %c0_i32_0 = arith.constant 0 : i32
    return %arg0, %c0_i32 : i32, i32
  }
}

module attributes {stable_mosaic.version = 11 : i64} {
  func.func @attn_kernel(%arg0: i32, %arg1: memref<8x8x32xbf16, #tpu.memory_space<vmem>>, %arg2: memref<8x8x32xbf16, #tpu.memory_space<vmem>>, %arg3: memref<8x8x32xbf16, #tpu.memory_space<vmem>>, %arg4: memref<8x8x32xbf16, #tpu.memory_space<vmem>>) attributes {dimension_semantics = [#tpu.dimension_semantics<parallel>], iteration_bounds = array<i64: 1>, scalar_prefetch = 0 : i64, scratch_operands = 0 : i64, tpu.core_type = #tpu.core_type<tc>, window_params = [{transform_indices = @transform_0, window_bounds = array<i64: 8, 8, 32>}, {transform_indices = @transform_1, window_bounds = array<i64: 8, 8, 32>}, {transform_indices = @transform_2, window_bounds = array<i64: 8, 8, 32>}, {transform_indices = @transform_3, window_bounds = array<i64: 8, 8, 32>}]} {
    %c0 = arith.constant 0 : index
    %c0_0 = arith.constant 0 : index
    %c0_1 = arith.constant 0 : index
    %0 = vector.load %arg1[%c0, %c0_0, %c0_1] : memref<8x8x32xbf16, #tpu.memory_space<vmem>>, vector<8x8x32xbf16>
    %c0_2 = arith.constant 0 : index
    %c0_3 = arith.constant 0 : index
    %c0_4 = arith.constant 0 : index
    %1 = vector.load %arg2[%c0_2, %c0_3, %c0_4] : memref<8x8x32xbf16, #tpu.memory_space<vmem>>, vector<8x8x32xbf16>
    %c0_5 = arith.constant 0 : index
    %c0_6 = arith.constant 0 : index
    %c0_7 = arith.constant 0 : index
    %2 = vector.load %arg3[%c0_5, %c0_6, %c0_7] : memref<8x8x32xbf16, #tpu.memory_space<vmem>>, vector<8x8x32xbf16>
    "tpu.trace_start"() <{level = 10 : i32, message = "gqd,gkd->gqk"}> : () -> ()
    %cst = arith.constant dense<0.000000e+00> : vector<8x8x8xf32>
    %3 = tpu.matmul %0, %1, %cst {dimension_numbers = #tpu.dot_dimension_numbers<[2], [2], [1], [1], [0, 0, 0, 1, 1, 1], [0], [0]>} : vector<8x8x32xbf16>, vector<8x8x32xbf16>, vector<8x8x8xf32> -> vector<8x8x8xf32>
    "tpu.trace_stop"() : () -> ()
    %cst_8 = arith.constant 0.176776692 : f32
    %4 = vector.broadcast %cst_8 : f32 to vector<8x8x8xf32>
    %5 = arith.mulf %3, %4 : vector<8x8x8xf32>
    %6 = tpu.iota {dimensions = array<i32: 0>} : vector<8x8xi32>
    %7 = tpu.iota {dimensions = array<i32: 1>} : vector<8x8xi32>
    %8 = arith.cmpi sge, %6, %7 : vector<8x8xi32>
    %9 = vector.shape_cast %8 : vector<8x8xi1> to vector<1x8x8xi1>
    %cst_9 = arith.constant -1.000000e+30 : f32
    %10 = vector.shape_cast %9 : vector<1x8x8xi1> to vector<1x8x8xi1>
    %11 = vector.broadcast %10 : vector<1x8x8xi1> to vector<8x8x8xi1>
    %12 = vector.broadcast %cst_9 : f32 to vector<8x8x8xf32>
    %13 = arith.select %11, %5, %12 : vector<8x8x8xi1>, vector<8x8x8xf32>
    %cst_10 = arith.constant dense<0xFF800000> : vector<8x8xf32>
    %14 = vector.multi_reduction <maximumf>, %13, %cst_10 [2] : vector<8x8x8xf32> to vector<8x8xf32>
    %15 = vector.shape_cast %14 : vector<8x8xf32> to vector<8x8x1xf32>
    %16 = vector.broadcast %15 : vector<8x8x1xf32> to vector<8x8x8xf32>
    %17 = arith.subf %13, %16 : vector<8x8x8xf32>
    %18 = math.exp %17 : vector<8x8x8xf32>
    %cst_11 = arith.constant dense<0.000000e+00> : vector<8x8xf32>
    %19 = vector.multi_reduction <add>, %18, %cst_11 [2] : vector<8x8x8xf32> to vector<8x8xf32>
    %20 = vector.shape_cast %19 : vector<8x8xf32> to vector<8x8x1xf32>
    %21 = tpu.reciprocal %20 {approx = true} : vector<8x8x1xf32> -> vector<8x8x1xf32>
    %22 = vector.broadcast %21 : vector<8x8x1xf32> to vector<8x8x8xf32>
    %23 = arith.mulf %18, %22 : vector<8x8x8xf32>
    %24 = arith.truncf %23 : vector<8x8x8xf32> to vector<8x8x8xbf16>
    "tpu.trace_start"() <{level = 10 : i32, message = "gqk,gkd->gqd"}> : () -> ()
    %cst_12 = arith.constant dense<0.000000e+00> : vector<8x8x32xf32>
    %25 = tpu.matmul %24, %2, %cst_12 {dimension_numbers = #tpu.dot_dimension_numbers<[2], [1], [1], [2], [0, 0, 0, 1, 1, 2], [0], [0]>} : vector<8x8x8xbf16>, vector<8x8x32xbf16>, vector<8x8x32xf32> -> vector<8x8x32xf32>
    "tpu.trace_stop"() : () -> ()
    %26 = arith.truncf %25 : vector<8x8x32xf32> to vector<8x8x32xbf16>
    %c0_13 = arith.constant 0 : index
    %c0_14 = arith.constant 0 : index
    %c0_15 = arith.constant 0 : index
    %27 = vector.load %arg4[%c0_13, %c0_14, %c0_15] : memref<8x8x32xbf16, #tpu.memory_space<vmem>>, vector<8x8x32xbf16>
    tpu.vector_store %arg4[%c0_13, %c0_14, %c0_15], %26 {strides = array<i32>} : memref<8x8x32xbf16, #tpu.memory_space<vmem>>, vector<8x8x32xbf16>,
    return
  }
  func.func @transform_0(%arg0: i32) -> (i32, i32, i32) {
    %c0_i32 = arith.constant 0 : i32
    %c0_i32_0 = arith.constant 0 : i32
    %c0_i32_1 = arith.constant 0 : i32
    return %arg0, %c0_i32, %c0_i32_0 : i32, i32, i32
  }
  func.func @transform_1(%arg0: i32) -> (i32, i32, i32) {
    %c0_i32 = arith.constant 0 : i32
    %c0_i32_0 = arith.constant 0 : i32
    %c0_i32_1 = arith.constant 0 : i32
    return %arg0, %c0_i32, %c0_i32_0 : i32, i32, i32
  }
  func.func @transform_2(%arg0: i32) -> (i32, i32, i32) {
    %c0_i32 = arith.constant 0 : i32
    %c0_i32_0 = arith.constant 0 : i32
    %c0_i32_1 = arith.constant 0 : i32
    return %arg0, %c0_i32, %c0_i32_0 : i32, i32, i32
  }
  func.func @transform_3(%arg0: i32) -> (i32, i32, i32) {
    %c0_i32 = arith.constant 0 : i32
    %c0_i32_0 = arith.constant 0 : i32
    %c0_i32_1 = arith.constant 0 : i32
    return %arg0, %c0_i32, %c0_i32_0 : i32, i32, i32
  }
}

module attributes {stable_mosaic.version = 11 : i64} {
  func.func @head_kernel(%arg0: i32, %arg1: i32, %arg2: memref<16x128xf32, #tpu.memory_space<vmem>>, %arg3: memref<1x128xf32, #tpu.memory_space<vmem>>, %arg4: memref<1x128xf32, #tpu.memory_space<vmem>>, %arg5: memref<128x128xbf16, #tpu.memory_space<vmem>>, %arg6: memref<16x128xf32, #tpu.memory_space<vmem>>) attributes {dimension_semantics = [#tpu.dimension_semantics<parallel>, #tpu.dimension_semantics<parallel>], iteration_bounds = array<i64: 1, 1>, scalar_prefetch = 0 : i64, scratch_operands = 0 : i64, tpu.core_type = #tpu.core_type<tc>, window_params = [{transform_indices = @transform_0, window_bounds = array<i64: 16, 128>}, {pipeline_mode = #tpu.pipeline_mode<synchronous>, transform_indices = @transform_1, window_bounds = array<i64: 1, 128>}, {pipeline_mode = #tpu.pipeline_mode<synchronous>, transform_indices = @transform_2, window_bounds = array<i64: 1, 128>}, {transform_indices = @transform_3, window_bounds = array<i64: 128, 128>}, {transform_indices = @transform_4, window_bounds = array<i64: 16, 128>}]} {
    %c0 = arith.constant 0 : index
    %c0_0 = arith.constant 0 : index
    %0 = vector.load %arg2[%c0, %c0_0] : memref<16x128xf32, #tpu.memory_space<vmem>>, vector<16x128xf32>
    %c0_1 = arith.constant 0 : index
    %c0_2 = arith.constant 0 : index
    %1 = vector.load %arg3[%c0_1, %c0_2] : memref<1x128xf32, #tpu.memory_space<vmem>>, vector<1x128xf32>
    %c0_3 = arith.constant 0 : index
    %c0_4 = arith.constant 0 : index
    %2 = vector.load %arg4[%c0_3, %c0_4] : memref<1x128xf32, #tpu.memory_space<vmem>>, vector<1x128xf32>
    %cst = arith.constant dense<0.000000e+00> : vector<16xf32>
    %3 = vector.multi_reduction <add>, %0, %cst [1] : vector<16x128xf32> to vector<16xf32>
    %4 = vector.shape_cast %3 : vector<16xf32> to vector<16x1xf32>
    %cst_5 = arith.constant 1.280000e+02 : f32
    %5 = vector.broadcast %cst_5 : f32 to vector<16x1xf32>
    %6 = arith.divf %4, %5 : vector<16x1xf32>
    %7 = vector.broadcast %6 : vector<16x1xf32> to vector<16x128xf32>
    %8 = arith.subf %0, %7 : vector<16x128xf32>
    %9 = arith.mulf %8, %8 : vector<16x128xf32>
    %cst_6 = arith.constant dense<0.000000e+00> : vector<16xf32>
    %10 = vector.multi_reduction <add>, %9, %cst_6 [1] : vector<16x128xf32> to vector<16xf32>
    %11 = vector.shape_cast %10 : vector<16xf32> to vector<16x1xf32>
    %cst_7 = arith.constant 1.280000e+02 : f32
    %12 = vector.broadcast %cst_7 : f32 to vector<16x1xf32>
    %13 = arith.divf %11, %12 : vector<16x1xf32>
    %14 = vector.broadcast %6 : vector<16x1xf32> to vector<16x128xf32>
    %15 = arith.subf %0, %14 : vector<16x128xf32>
    %cst_8 = arith.constant 9.99999974E-6 : f32
    %16 = vector.broadcast %cst_8 : f32 to vector<16x1xf32>
    %17 = arith.addf %13, %16 : vector<16x1xf32>
    %18 = math.rsqrt %17 : vector<16x1xf32>
    %19 = vector.broadcast %18 : vector<16x1xf32> to vector<16x128xf32>
    %20 = arith.mulf %15, %19 : vector<16x128xf32>
    %21 = vector.broadcast %1 : vector<1x128xf32> to vector<16x128xf32>
    %22 = arith.mulf %20, %21 : vector<16x128xf32>
    %23 = vector.broadcast %2 : vector<1x128xf32> to vector<16x128xf32>
    %24 = arith.addf %22, %23 : vector<16x128xf32>
    %25 = arith.truncf %24 : vector<16x128xf32> to vector<16x128xbf16>
    %c0_9 = arith.constant 0 : index
    %c0_10 = arith.constant 0 : index
    %26 = vector.load %arg5[%c0_9, %c0_10] : memref<128x128xbf16, #tpu.memory_space<vmem>>, vector<128x128xbf16>
    %cst_11 = arith.constant dense<0.000000e+00> : vector<16x128xf32>
    %27 = tpu.matmul %25, %26, %cst_11 {dimension_numbers = #tpu.dot_dimension_numbers<[1], [0], [0], [1], [0, 0, 1, 1], [], []>} : vector<16x128xbf16>, vector<128x128xbf16>, vector<16x128xf32> -> vector<16x128xf32>
    %c0_12 = arith.constant 0 : index
    %c0_13 = arith.constant 0 : index
    %28 = vector.load %arg6[%c0_12, %c0_13] : memref<16x128xf32, #tpu.memory_space<vmem>>, vector<16x128xf32>
    tpu.vector_store %arg6[%c0_12, %c0_13], %27 {strides = array<i32>} : memref<16x128xf32, #tpu.memory_space<vmem>>, vector<16x128xf32>,
    return
  }
  func.func @transform_0(%arg0: i32, %arg1: i32) -> (i32, i32) {
    %c0_i32 = arith.constant 0 : i32
    %c0_i32_0 = arith.constant 0 : i32
    return %arg0, %c0_i32 : i32, i32
  }
  func.func @transform_1(%arg0: i32, %arg1: i32) -> (i32, i32) {
    %c0_i32 = arith.constant 0 : i32
    %c0_i32_0 = arith.constant 0 : i32
    %c0_i32_1 = arith.constant 0 : i32
    return %c0_i32, %c0_i32_0 : i32, i32
  }
  func.func @transform_2(%arg0: i32, %arg1: i32) -> (i32, i32) {
    %c0_i32 = arith.constant 0 : i32
    %c0_i32_0 = arith.constant 0 : i32
    %c0_i32_1 = arith.constant 0 : i32
    return %c0_i32, %c0_i32_0 : i32, i32
  }
  func.func @transform_3(%arg0: i32, %arg1: i32) -> (i32, i32) {
    %c0_i32 = arith.constant 0 : i32
    %c0_i32_0 = arith.constant 0 : i32
    return %c0_i32, %arg1 : i32, i32
  }
  func.func @transform_4(%arg0: i32, %arg1: i32) -> (i32, i32) {
    %c0_i32 = arith.constant 0 : i32
    return %arg0, %arg1 : i32, i32
  }
}

module attributes {stable_mosaic.version = 11 : i64} {
  func.func @proj_mlp_kernel(%arg0: i32, %arg1: memref<16x128xf32, #tpu.memory_space<vmem>>, %arg2: memref<16x128xbf16, #tpu.memory_space<vmem>>, %arg3: memref<128x128xbf16, #tpu.memory_space<vmem>>, %arg4: memref<1x128xf32, #tpu.memory_space<vmem>>, %arg5: memref<1x128xf32, #tpu.memory_space<vmem>>, %arg6: memref<1x128xf32, #tpu.memory_space<vmem>>, %arg7: memref<128x512xbf16, #tpu.memory_space<vmem>>, %arg8: memref<1x512xf32, #tpu.memory_space<vmem>>, %arg9: memref<512x128xbf16, #tpu.memory_space<vmem>>, %arg10: memref<1x128xf32, #tpu.memory_space<vmem>>, %arg11: memref<16x128xf32, #tpu.memory_space<vmem>>) attributes {dimension_semantics = [#tpu.dimension_semantics<parallel>], iteration_bounds = array<i64: 1>, scalar_prefetch = 0 : i64, scratch_operands = 0 : i64, tpu.core_type = #tpu.core_type<tc>, window_params = [{transform_indices = @transform_0, window_bounds = array<i64: 16, 128>}, {transform_indices = @transform_1, window_bounds = array<i64: 16, 128>}, {pipeline_mode = #tpu.pipeline_mode<synchronous>, transform_indices = @transform_2, window_bounds = array<i64: 128, 128>}, {pipeline_mode = #tpu.pipeline_mode<synchronous>, transform_indices = @transform_3, window_bounds = array<i64: 1, 128>}, {pipeline_mode = #tpu.pipeline_mode<synchronous>, transform_indices = @transform_4, window_bounds = array<i64: 1, 128>}, {pipeline_mode = #tpu.pipeline_mode<synchronous>, transform_indices = @transform_5, window_bounds = array<i64: 1, 128>}, {pipeline_mode = #tpu.pipeline_mode<synchronous>, transform_indices = @transform_6, window_bounds = array<i64: 128, 512>}, {pipeline_mode = #tpu.pipeline_mode<synchronous>, transform_indices = @transform_7, window_bounds = array<i64: 1, 512>}, {pipeline_mode = #tpu.pipeline_mode<synchronous>, transform_indices = @transform_8, window_bounds = array<i64: 512, 128>}, {pipeline_mode = #tpu.pipeline_mode<synchronous>, transform_indices = @transform_9, window_bounds = array<i64: 1, 128>}, {transform_indices = @transform_10, window_bounds = array<i64: 16, 128>}]} {
    %c0 = arith.constant 0 : index
    %c0_0 = arith.constant 0 : index
    %0 = vector.load %arg1[%c0, %c0_0] : memref<16x128xf32, #tpu.memory_space<vmem>>, vector<16x128xf32>
    %c0_1 = arith.constant 0 : index
    %c0_2 = arith.constant 0 : index
    %1 = vector.load %arg2[%c0_1, %c0_2] : memref<16x128xbf16, #tpu.memory_space<vmem>>, vector<16x128xbf16>
    %c0_3 = arith.constant 0 : index
    %c0_4 = arith.constant 0 : index
    %2 = vector.load %arg3[%c0_3, %c0_4] : memref<128x128xbf16, #tpu.memory_space<vmem>>, vector<128x128xbf16>
    %cst = arith.constant dense<0.000000e+00> : vector<16x128xf32>
    %3 = tpu.matmul %1, %2, %cst {dimension_numbers = #tpu.dot_dimension_numbers<[1], [0], [0], [1], [0, 0, 1, 1], [], []>} : vector<16x128xbf16>, vector<128x128xbf16>, vector<16x128xf32> -> vector<16x128xf32>
    %c0_5 = arith.constant 0 : index
    %c0_6 = arith.constant 0 : index
    %4 = vector.load %arg4[%c0_5, %c0_6] : memref<1x128xf32, #tpu.memory_space<vmem>>, vector<1x128xf32>
    %5 = vector.broadcast %4 : vector<1x128xf32> to vector<16x128xf32>
    %6 = arith.addf %3, %5 : vector<16x128xf32>
    %7 = arith.addf %0, %6 : vector<16x128xf32>
    %c0_7 = arith.constant 0 : index
    %c0_8 = arith.constant 0 : index
    %8 = vector.load %arg5[%c0_7, %c0_8] : memref<1x128xf32, #tpu.memory_space<vmem>>, vector<1x128xf32>
    %c0_9 = arith.constant 0 : index
    %c0_10 = arith.constant 0 : index
    %9 = vector.load %arg6[%c0_9, %c0_10] : memref<1x128xf32, #tpu.memory_space<vmem>>, vector<1x128xf32>
    %cst_11 = arith.constant dense<0.000000e+00> : vector<16xf32>
    %10 = vector.multi_reduction <add>, %7, %cst_11 [1] : vector<16x128xf32> to vector<16xf32>
    %11 = vector.shape_cast %10 : vector<16xf32> to vector<16x1xf32>
    %cst_12 = arith.constant 1.280000e+02 : f32
    %12 = vector.broadcast %cst_12 : f32 to vector<16x1xf32>
    %13 = arith.divf %11, %12 : vector<16x1xf32>
    %14 = vector.broadcast %13 : vector<16x1xf32> to vector<16x128xf32>
    %15 = arith.subf %7, %14 : vector<16x128xf32>
    %16 = arith.mulf %15, %15 : vector<16x128xf32>
    %cst_13 = arith.constant dense<0.000000e+00> : vector<16xf32>
    %17 = vector.multi_reduction <add>, %16, %cst_13 [1] : vector<16x128xf32> to vector<16xf32>
    %18 = vector.shape_cast %17 : vector<16xf32> to vector<16x1xf32>
    %cst_14 = arith.constant 1.280000e+02 : f32
    %19 = vector.broadcast %cst_14 : f32 to vector<16x1xf32>
    %20 = arith.divf %18, %19 : vector<16x1xf32>
    %21 = vector.broadcast %13 : vector<16x1xf32> to vector<16x128xf32>
    %22 = arith.subf %7, %21 : vector<16x128xf32>
    %cst_15 = arith.constant 9.99999974E-6 : f32
    %23 = vector.broadcast %cst_15 : f32 to vector<16x1xf32>
    %24 = arith.addf %20, %23 : vector<16x1xf32>
    %25 = math.rsqrt %24 : vector<16x1xf32>
    %26 = vector.broadcast %25 : vector<16x1xf32> to vector<16x128xf32>
    %27 = arith.mulf %22, %26 : vector<16x128xf32>
    %28 = vector.broadcast %8 : vector<1x128xf32> to vector<16x128xf32>
    %29 = arith.mulf %27, %28 : vector<16x128xf32>
    %30 = vector.broadcast %9 : vector<1x128xf32> to vector<16x128xf32>
    %31 = arith.addf %29, %30 : vector<16x128xf32>
    %32 = arith.truncf %31 : vector<16x128xf32> to vector<16x128xbf16>
    %c0_16 = arith.constant 0 : index
    %c0_17 = arith.constant 0 : index
    %33 = vector.load %arg7[%c0_16, %c0_17] : memref<128x512xbf16, #tpu.memory_space<vmem>>, vector<128x512xbf16>
    %cst_18 = arith.constant dense<0.000000e+00> : vector<16x512xf32>
    %34 = tpu.matmul %32, %33, %cst_18 {dimension_numbers = #tpu.dot_dimension_numbers<[1], [0], [0], [1], [0, 0, 1, 1], [], []>} : vector<16x128xbf16>, vector<128x512xbf16>, vector<16x512xf32> -> vector<16x512xf32>
    %c0_19 = arith.constant 0 : index
    %c0_20 = arith.constant 0 : index
    %35 = vector.load %arg8[%c0_19, %c0_20] : memref<1x512xf32, #tpu.memory_space<vmem>>, vector<1x512xf32>
    %36 = vector.broadcast %35 : vector<1x512xf32> to vector<16x512xf32>
    %37 = arith.addf %34, %36 : vector<16x512xf32>
    %cst_21 = arith.constant 5.000000e-01 : f32
    %38 = vector.broadcast %cst_21 : f32 to vector<16x512xf32>
    %39 = arith.mulf %38, %37 : vector<16x512xf32>
    %cst_22 = arith.constant 4.471500e-02 : f32
    %40 = vector.broadcast %cst_22 : f32 to vector<16x512xf32>
    %41 = arith.mulf %40, %37 : vector<16x512xf32>
    %42 = arith.mulf %41, %37 : vector<16x512xf32>
    %43 = arith.mulf %42, %37 : vector<16x512xf32>
    %44 = arith.addf %37, %43 : vector<16x512xf32>
    %cst_23 = arith.constant 0.797884583 : f32
    %45 = vector.broadcast %cst_23 : f32 to vector<16x512xf32>
    %46 = arith.mulf %45, %44 : vector<16x512xf32>
    %47 = math.tanh %46 : vector<16x512xf32>
    %cst_24 = arith.constant 1.000000e+00 : f32
    %48 = vector.broadcast %cst_24 : f32 to vector<16x512xf32>
    %49 = arith.addf %48, %47 : vector<16x512xf32>
    %50 = arith.mulf %39, %49 : vector<16x512xf32>
    %51 = arith.truncf %50 : vector<16x512xf32> to vector<16x512xbf16>
    %c0_25 = arith.constant 0 : index
    %c0_26 = arith.constant 0 : index
    %52 = vector.load %arg9[%c0_25, %c0_26] : memref<512x128xbf16, #tpu.memory_space<vmem>>, vector<512x128xbf16>
    %cst_27 = arith.constant dense<0.000000e+00> : vector<16x128xf32>
    %53 = tpu.matmul %51, %52, %cst_27 {dimension_numbers = #tpu.dot_dimension_numbers<[1], [0], [0], [1], [0, 0, 1, 1], [], []>} : vector<16x512xbf16>, vector<512x128xbf16>, vector<16x128xf32> -> vector<16x128xf32>
    %c0_28 = arith.constant 0 : index
    %c0_29 = arith.constant 0 : index
    %54 = vector.load %arg10[%c0_28, %c0_29] : memref<1x128xf32, #tpu.memory_space<vmem>>, vector<1x128xf32>
    %55 = vector.broadcast %54 : vector<1x128xf32> to vector<16x128xf32>
    %56 = arith.addf %53, %55 : vector<16x128xf32>
    %57 = arith.addf %7, %56 : vector<16x128xf32>
    %c0_30 = arith.constant 0 : index
    %c0_31 = arith.constant 0 : index
    %58 = vector.load %arg11[%c0_30, %c0_31] : memref<16x128xf32, #tpu.memory_space<vmem>>, vector<16x128xf32>
    tpu.vector_store %arg11[%c0_30, %c0_31], %57 {strides = array<i32>} : memref<16x128xf32, #tpu.memory_space<vmem>>, vector<16x128xf32>,
    return
  }
  func.func @transform_0(%arg0: i32) -> (i32, i32) {
    %c0_i32 = arith.constant 0 : i32
    %c0_i32_0 = arith.constant 0 : i32
    return %arg0, %c0_i32 : i32, i32
  }
  func.func @transform_1(%arg0: i32) -> (i32, i32) {
    %c0_i32 = arith.constant 0 : i32
    %c0_i32_0 = arith.constant 0 : i32
    return %arg0, %c0_i32 : i32, i32
  }
  func.func @transform_2(%arg0: i32) -> (i32, i32) {
    %c0_i32 = arith.constant 0 : i32
    %c0_i32_0 = arith.constant 0 : i32
    %c0_i32_1 = arith.constant 0 : i32
    return %c0_i32, %c0_i32_0 : i32, i32
  }
  func.func @transform_3(%arg0: i32) -> (i32, i32) {
    %c0_i32 = arith.constant 0 : i32
    %c0_i32_0 = arith.constant 0 : i32
    %c0_i32_1 = arith.constant 0 : i32
    return %c0_i32, %c0_i32_0 : i32, i32
  }
  func.func @transform_4(%arg0: i32) -> (i32, i32) {
    %c0_i32 = arith.constant 0 : i32
    %c0_i32_0 = arith.constant 0 : i32
    %c0_i32_1 = arith.constant 0 : i32
    return %c0_i32, %c0_i32_0 : i32, i32
  }
  func.func @transform_5(%arg0: i32) -> (i32, i32) {
    %c0_i32 = arith.constant 0 : i32
    %c0_i32_0 = arith.constant 0 : i32
    %c0_i32_1 = arith.constant 0 : i32
    return %c0_i32, %c0_i32_0 : i32, i32
  }
  func.func @transform_6(%arg0: i32) -> (i32, i32) {
    %c0_i32 = arith.constant 0 : i32
    %c0_i32_0 = arith.constant 0 : i32
    %c0_i32_1 = arith.constant 0 : i32
    return %c0_i32, %c0_i32_0 : i32, i32
  }
  func.func @transform_7(%arg0: i32) -> (i32, i32) {
    %c0_i32 = arith.constant 0 : i32
    %c0_i32_0 = arith.constant 0 : i32
    %c0_i32_1 = arith.constant 0 : i32
    return %c0_i32, %c0_i32_0 : i32, i32
  }
  func.func @transform_8(%arg0: i32) -> (i32, i32) {
    %c0_i32 = arith.constant 0 : i32
    %c0_i32_0 = arith.constant 0 : i32
    %c0_i32_1 = arith.constant 0 : i32
    return %c0_i32, %c0_i32_0 : i32, i32
  }
  func.func @transform_9(%arg0: i32) -> (i32, i32) {
    %c0_i32 = arith.constant 0 : i32
    %c0_i32_0 = arith.constant 0 : i32
    %c0_i32_1 = arith.constant 0 : i32
    return %c0_i32, %c0_i32_0 : i32, i32
  }
  func.func @transform_10(%arg0: i32) -> (i32, i32) {
    %c0_i32 = arith.constant 0 : i32
    %c0_i32_0 = arith.constant 0 : i32
    return %arg0, %c0_i32 : i32, i32
  }
}

</mosaic_0001>

<bundles_post_ra>
// kernel: _lambda_.7
= control target key start
LH: loop header
LB: loop body
LE: loop exit
PB: predicated region body
PF: predicated region fallthrough
CT: control target
= control target key end

     0   :  { %10 = vsyncpa [#allocation3], 0  ;;  %s831_s0 = inlined_call_operand.hbm [shape: f32[16,128], index: 0, kind: input, shape index: {}]   ;;  %s832_s1 = inlined_call_operand.hbm [shape: f32[1,128], index: 1, kind: input, shape index: {}]   ;;  %s833_s2 = inlined_call_operand.hbm [shape: f32[1,128], index: 2, kind: input, shape index: {}]   ;;  %s834_s3 = inlined_call_operand.hbm [shape: bf16[128,384], index: 3, kind: input, shape index: {}]   ;;  %s835_s4 = inlined_call_operand.hbm [shape: f32[1,384], index: 4, kind: input, shape index: {}]   ;;  %s836_s5 = inlined_call_operand.hbm [shape: bf16[16,384], index: 5, kind: output, shape index: {}]  }
   0x1   :  { %11 = vsyncpa [#allocation6], 0 }
   0x2   :  { %12 = vsyncpa [#allocation9], 0 }
   0x3   :  { %13 = vsyncpa [#allocation4], 0  ;;  %s684_s18 = smov [#allocation5]   ;;  %s685_s20 = smov [#allocation8]  }
   0x4   :  { %s32_s19 = sshll.u32 %s684_s18, 4  ;;  %s51_s21 = sshll.u32 %s685_s20, 4  ;;  %s33_s19 = int_to_ptr.vmem [resolvable:$true] %s32_s19  ;;  %s727_s21 = int_to_ptr.vmem [resolvable:$true] %s51_s21 }
   0x5   :  { %s544_s24 = scalar_lea.hbm %s832_s1, 16 }
   0x6   :  { %p545_p0 = scmp.ne.s32.totalorder %s832_s1, %s544_s24  ;;  %p548_p1 = scmp.lt.u32.totalorder %s544_s24, %s832_s1 }
   0x8   :  { %p550_p2 = pnand %p548_p1, %p545_p0 }
   0xa   :  { %553 = shalt.err (!%p550_p2)
}
   0xb   :  { %s554_s29 = scalar_lea.vmem %s33_s19, 16  ;;  %s558_s30 = scalar_lea.vmem %s33_s19, 32 }
   0xc   :  { %p555_p3 = scmp.ne.s32.totalorder %s33_s19, %s554_s29  ;;  %p559_p4 = scmp.lt.s32.totalorder %s33_s19, %s33_s19 }
   0xd   :  { %p560_p5 = scmp.lt.s32.totalorder %s558_s30, %s554_s29 }
   0xf   :  { %p561_p6 = por %p560_p5, %p559_p4 }
  0x11   :  { %p562_p7 = pnand %p561_p6, %p555_p3 }
  0x13   :  { %565 = shalt.err (!%p562_p7)
}
  0x14   :  { %35 = dma.hbm_to_vmem [thread:$0]  %s832_s1, 16, %s33_s19, [#allocation6]  }
  0x15   :  { %s566_s10 = scalar_lea.hbm %s834_s3, 3072 }
  0x16   :  { %p567_p8 = scmp.ne.s32.totalorder %s834_s3, %s566_s10  ;;  %p570_p9 = scmp.lt.u32.totalorder %s566_s10, %s834_s3 }
  0x18   :  { %p572_p10 = pnand %p570_p9, %p567_p8 }
  0x1a   :  { %575 = shalt.err (!%p572_p10)
}
  0x1b   :  { %s576_s15 = scalar_lea.vmem %s727_s21, 3072  ;;  %p581_p12 = scmp.lt.s32.totalorder %s727_s21, %s727_s21 }
  0x1c   :  { %p577_p11 = scmp.ne.s32.totalorder %s727_s21, %s576_s15  ;;  %p582_p13 = scmp.lt.s32.totalorder %s576_s15, %s576_s15 }
  0x1e   :  { %p583_p0 = por %p582_p13, %p581_p12 }
  0x20   :  { %p584_p1 = pnand %p583_p0, %p577_p11 }
  0x22   :  { %587 = shalt.err (!%p584_p1)
}
  0x23   :  { %s686_s1 = smov 192   ;;  %s687_s16 = smov 12  }
  0x24   :  { %57 = dma.hbm_to_vmem [thread:$0]  %s834_s3, 3072, %s727_s21, [#allocation9], %s686_s1, %s686_s1, %s687_s16  }
  0x25   :  { %s688_s19 = smov [#allocation2]   ;;  %s588_s24 = scalar_lea.hbm %s831_s0, 256 }
  0x26   :  { %s19_s20 = sshll.u32 %s688_s19, 4  ;;  %p589_p2 = scmp.ne.s32.totalorder %s831_s0, %s588_s24  ;;  %s20_s20 = int_to_ptr.vmem [resolvable:$true] %s19_s20 }
  0x27   :  { %p592_p3 = scmp.lt.u32.totalorder %s588_s24, %s831_s0 }
  0x29   :  { %p594_p4 = pnand %p592_p3, %p589_p2 }
  0x2b   :  { %597 = shalt.err (!%p594_p4)
}
  0x2c   :  { %s598_s29 = scalar_lea.vmem %s20_s20, 256  ;;  %p603_p6 = scmp.lt.s32.totalorder %s20_s20, %s20_s20 }
  0x2d   :  { %p599_p5 = scmp.ne.s32.totalorder %s20_s20, %s598_s29  ;;  %p604_p7 = scmp.lt.s32.totalorder %s598_s29, %s598_s29 }
  0x2f   :  { %p605_p8 = por %p604_p7, %p603_p6 }
  0x31   :  { %p606_p9 = pnand %p605_p8, %p599_p5 }
  0x33   :  { %609 = shalt.err (!%p606_p9)
}
  0x34   :  { %s689_s3 = smov 128   ;;  %s690_s21 = smov 8  }
  0x35   :  { %25 = dma.hbm_to_vmem [thread:$0]  %s831_s0, 256, %s20_s20, [#allocation3], %s689_s3, %s689_s3, %s690_s21  }
  0x36   :  { %s691_s7 = smov [#allocation7]   ;;  %s692_s9 = smov [#allocation10]  }
  0x37   :  { %s42_s8 = sshll.u32 %s691_s7, 4  ;;  %s64_s10 = sshll.u32 %s692_s9, 4  ;;  %s43_s8 = int_to_ptr.vmem [resolvable:$true] %s42_s8  ;;  %s65_s10 = int_to_ptr.vmem [resolvable:$true] %s64_s10 }
  0x38   :  { %s610_s13 = scalar_lea.hbm %s833_s2, 16 }
  0x39   :  { %p611_p10 = scmp.ne.s32.totalorder %s833_s2, %s610_s13  ;;  %p614_p11 = scmp.lt.u32.totalorder %s610_s13, %s833_s2 }
  0x3b   :  { %p616_p12 = pnand %p614_p11, %p611_p10 }
  0x3d   :  { %619 = shalt.err (!%p616_p12)
}
  0x3e   :  { %s620_s0 = scalar_lea.vmem %s43_s8, 16  ;;  %s624_s19 = scalar_lea.vmem %s43_s8, 32 }
  0x3f   :  { %p621_p13 = scmp.ne.s32.totalorder %s43_s8, %s620_s0  ;;  %p625_p0 = scmp.lt.s32.totalorder %s43_s8, %s43_s8 }
  0x40   :  { %p626_p1 = scmp.lt.s32.totalorder %s624_s19, %s620_s0 }
  0x42   :  { %p627_p2 = por %p626_p1, %p625_p0 }
  0x44   :  { %p628_p3 = pnand %p627_p2, %p621_p13 }
  0x46   :  { %631 = shalt.err (!%p628_p3)
}
  0x47   :  { %45 = dma.hbm_to_vmem [thread:$0]  %s833_s2, 16, %s43_s8, [#allocation6]  }
  0x48   :  { %s632_s25 = scalar_lea.hbm %s835_s4, 48 }
  0x49   :  { %p633_p4 = scmp.ne.s32.totalorder %s835_s4, %s632_s25  ;;  %p636_p5 = scmp.lt.u32.totalorder %s632_s25, %s835_s4 }
  0x4b   :  { %p638_p6 = pnand %p636_p5, %p633_p4 }
  0x4d   :  { %641 = shalt.err (!%p638_p6)
}
  0x4e   :  { %s642_s3 = scalar_lea.vmem %s65_s10, 48  ;;  %s646_s21 = scalar_lea.vmem %s65_s10, 64 }
  0x4f   :  { %p643_p7 = scmp.ne.s32.totalorder %s65_s10, %s642_s3  ;;  %p647_p8 = scmp.lt.s32.totalorder %s65_s10, %s65_s10 }
  0x50   :  { %p648_p9 = scmp.lt.s32.totalorder %s646_s21, %s642_s3 }
  0x52   :  { %p649_p10 = por %p648_p9, %p647_p8 }
  0x54   :  { %p650_p11 = pnand %p649_p10, %p643_p7 }
  0x56   :  { %653 = shalt.err (!%p650_p11)
}
  0x57   :  { %67 = dma.hbm_to_vmem [thread:$0]  %s835_s4, 48, %s65_s10, [#allocation9]  }
  0x58   :  { %676 = dma.done.wait [#allocation3], 256  }
  0x59   :  { %677 = vsyncadd [#allocation3], 4294967040 }
  0x5a   :  { %678 = dma.done.wait [#allocation6], 32  }
  0x5b   :  { %679 = vsyncadd [#allocation6], 4294967264 }
  0x5c   :  { %680 = dma.done.wait [#allocation9], 3120  }
  0x5d   :  { %681 = vsyncadd [#allocation9], 4294964176  ;;  %v84_v0 = vld [vmem:[#allocation2] sm:$0xff]  ;;  %v85_v1 = vld [vmem:[#allocation2 + $0x8] sm:$0xff]  ;;  %v693_v4 = vmov 0.0   ;;  %v694_v30 = vmov 0   ;;  %v162_v53 = vlaneseq }
  0x5e   :  { %88 = vadd.xlane.f32.xlu0 %v84_v0  ;;  %v508_v2 = vld [vmem:[#allocation8 + $0x4] ss:$12 sps:$4 sm:$0xff]   ;;  %v510_v3 = vld [vmem:[#allocation8] ss:$12 sps:$4 sm:$0xff]   ;;  %475 = vmatprep.subr.bf16.mxu1 %v693_v4  ;;  %v511_v5 = vld [vmem:[#allocation8 + $0x8] ss:$12 sps:$4 sm:$0xff]  }
  0x5f   :  { %v512_v6 = vld [vmem:[#allocation8 + $0x1c] ss:$12 sps:$4 sm:$0xff]   ;;  %305 = vmatprep.subr.bf16.mxu0 %v508_v2  ;;  %476 = vmatpush3.bf16.msra.mxu1 %v511_v5  ;;  %v514_v15 = vld [vmem:[#allocation8 + $0x18] ss:$12 sps:$4 sm:$0xff]   ;;  %v515_v16 = vld [vmem:[#allocation8 + $0x20] ss:$12 sps:$4 sm:$0xff]  }
  0x60   :  { %306 = vmatpush1.bf16.msra.mxu0 %v510_v3  ;;  %477 = vmatprep.subr.bf16.mxu1 %v693_v4  ;;  %v516_v17 = vld [vmem:[#allocation8 + $0x34] ss:$12 sps:$4 sm:$0xff]   ;;  %v518_v18 = vld [vmem:[#allocation8 + $0x30] ss:$12 sps:$4 sm:$0xff]   ;;  %v519_v19 = vld [vmem:[#allocation8 + $0x38] ss:$12 sps:$4 sm:$0xff]  }
  0x61   :  { %307 = vmatprep.subr.bf16.mxu0 %v512_v6  ;;  %v520_v20 = vld [vmem:[#allocation8 + $0x4c] ss:$12 sps:$4 sm:$0xff]   ;;  %v522_v21 = vld [vmem:[#allocation8 + $0x48] ss:$12 sps:$4 sm:$0xff]   ;;  %v523_v22 = vld [vmem:[#allocation8 + $0x50] ss:$12 sps:$4 sm:$0xff]   ;;  %337 = vmatprep.mubr.bf16.mxu0 %v694_v30 }
  0x62   :  { %90 = vadd.xlane.f32.xlu0 %v85_v1  ;;  %v524_v23 = vld [vmem:[#allocation8 + $0x64] ss:$12 sps:$4 sm:$0xff]   ;;  %v526_v24 = vld [vmem:[#allocation8 + $0x60] ss:$12 sps:$4 sm:$0xff]   ;;  %v527_v25 = vld [vmem:[#allocation8 + $0x68] ss:$12 sps:$4 sm:$0xff]  }
  0x63   :  { %478 = vmatpush3.bf16.msra.mxu1 %v515_v16  ;;  %v528_v26 = vld [vmem:[#allocation8 + $0x7c] ss:$12 sps:$4 sm:$0xff]   ;;  %v530_v27 = vld [vmem:[#allocation8 + $0x78] ss:$12 sps:$4 sm:$0xff]   ;;  %v531_v28 = vld [vmem:[#allocation8 + $0x80] ss:$12 sps:$4 sm:$0xff]  }
  0x64   :  { %308 = vmatpush1.bf16.msra.mxu0 %v514_v15  ;;  %479 = vmatprep.subr.bf16.mxu1 %v693_v4  ;;  %v532_v29 = vld [vmem:[#allocation8 + $0x94] ss:$12 sps:$4 sm:$0xff]   ;;  %vm695_vm0 = vmmov 0   ;;  %v534_v31 = vld [vmem:[#allocation8 + $0x90] ss:$12 sps:$4 sm:$0xff]   ;;  %v163_v54 = vshrl.u32 %v162_v53, 7 }
  0x65   :  { %309 = vmatprep.subr.bf16.mxu0 %v516_v17  ;;  %491 = vmatprep.mubr.msk.bf16.mxu1 %vm695_vm0, %v693_v4  ;;  %v535_v32 = vld [vmem:[#allocation8 + $0x98] ss:$12 sps:$4 sm:$0xff]   ;;  %v538_v34 = vld [vmem:[#allocation8 + $0xa8] ss:$12 sps:$4 sm:$0xff]   ;;  %v539_v35 = vld [vmem:[#allocation8 + $0xb0] ss:$12 sps:$4 sm:$0xff]  }
  0x66   :  { %v536_v33 = vld [vmem:[#allocation8 + $0xac] ss:$12 sps:$4 sm:$0xff]   ;;  %v432_v44 = vld [vmem:[#allocation5] ss:$0 sm:$0xff]  ;;  %v433_v48 = vld [vmem:[#allocation7] ss:$0 sm:$0xff] }
  0x67   :  { %480 = vmatpush3.bf16.msra.mxu1 %v519_v19  ;;  %v164_v55 = vsub.s32 0, %v163_v54  ;;  %v172_v56 = vsub.s32 2, %v163_v54  ;;  %v160_v57 = vld [vmem:[#allocation10] sm:$0x7]  ;;  %v168_v58 = vsub.s32 1, %v163_v54  ;;  %s696_s4 = smov [#allocation11]  }
  0x68   :  { %310 = vmatpush1.bf16.msra.mxu0 %v518_v18  ;;  %481 = vmatprep.subr.bf16.mxu1 %v693_v4  ;;  %s418_s6 = sshll.u32 %s696_s4, 4  ;;  %s419_s6 = int_to_ptr.vmem [resolvable:$true] %s418_s6 }
  0x69   :  { %311 = vmatprep.subr.bf16.mxu0 %v520_v20  ;;  %v165_v59 = vrot.slane %v160_v57, %v164_v55  ;;  %v173_v60 = vrot.slane %v160_v57, %v172_v56  ;;  %v169_v61 = vrot.slane %v160_v57, %v168_v58  ;;  %s654_s7 = scalar_lea.vmem %s419_s6, 384  ;;  %p659_p13 = scmp.lt.s32.totalorder %s419_s6, %s419_s6 }
  0x6a   :  { %p655_p12 = scmp.ne.s32.totalorder %s419_s6, %s654_s7  ;;  %p660_p0 = scmp.lt.s32.totalorder %s654_s7, %s654_s7 }
  0x6b   :  { %482 = vmatpush3.bf16.msra.mxu1 %v523_v22 }
  0x6c   :  { %312 = vmatpush1.bf16.msra.mxu0 %v522_v21  ;;  %483 = vmatprep.subr.bf16.mxu1 %v693_v4  ;;  %p661_p1 = por %p660_p0, %p659_p13 }
  0x6d   :  { %313 = vmatprep.subr.bf16.mxu0 %v524_v23 }
  0x6e   :  { %p662_p2 = pnand %p661_p1, %p655_p12 }
  0x6f   :  { %484 = vmatpush3.bf16.msra.mxu1 %v527_v25 }
  0x70   :  { %314 = vmatpush1.bf16.msra.mxu0 %v526_v24  ;;  %485 = vmatprep.subr.bf16.mxu1 %v693_v4 }
  0x71   :  { %315 = vmatprep.subr.bf16.mxu0 %v528_v26 }
  0x73   :  { %486 = vmatpush3.bf16.msra.mxu1 %v531_v28 }
  0x74   :  { %316 = vmatpush1.bf16.msra.mxu0 %v530_v27  ;;  %487 = vmatprep.subr.bf16.mxu1 %v693_v4 }
  0x75   :  { %317 = vmatprep.subr.bf16.mxu0 %v532_v29 }
  0x77   :  { %488 = vmatpush3.bf16.msra.mxu1 %v535_v32 }
  0x78   :  { %318 = vmatpush1.bf16.msra.mxu0 %v534_v31  ;;  %489 = vmatprep.subr.bf16.mxu1 %v693_v4 }
  0x79   :  { %319 = vmatprep.subr.bf16.mxu0 %v536_v33 }
  0x7b   :  { %490 = vmatpush3.bf16.msra.mxu1 %v539_v35 }
  0x7c   :  { %320 = vmatpush1.bf16.msra.mxu0 %v538_v34 }
  0xeb   :  { %v89_v7 = vpop.xlane.xlu0 %88 }
  0xec   :  { %v93_v8 = vmul.f32 0.0078125, %v89_v7 }
  0xee   :  { %v799_v9 = vsub.f32 %v84_v0, %v93_v8 }
  0xef   :  { %v91_v10 = vpop.xlane.xlu0 %90 }
  0xf0   :  { %v94_v11 = vmul.f32 0.0078125, %v91_v10  ;;  %v97_v12 = vmul.f32 %v799_v9, %v799_v9 }
  0xf2   :  { %v803_v13 = vsub.f32 %v85_v1, %v94_v11  ;;  %99 = vadd.xlane.f32.xlu1 %v97_v12 }
  0xf4   :  { %v98_v14 = vmul.f32 %v803_v13, %v803_v13 }
  0xf6   :  { %101 = vadd.xlane.f32.xlu1 %v98_v14 }
 0x17f   :  { %v100_v36 = vpop.xlane.xlu1 %99 }
 0x180   :  { %v103_v37 = vmul.f32 0.0078125, %v100_v36 }
 0x182   :  { %v105_v38 = vadd.f32 1e-05, %v103_v37 }
 0x183   :  { %v102_v39 = vpop.xlane.xlu1 %101 }
 0x184   :  { %540 = vrsqrt.f32 %v105_v38  ;;  %v104_v40 = vmul.f32 0.0078125, %v102_v39 }
 0x186   :  { %v106_v41 = vadd.f32 1e-05, %v104_v40 }
 0x188   :  { %542 = vrsqrt.f32 %v106_v41 }
 0x18e   :  { %v541_v42 = vpop.eup %540 }
 0x18f   :  { %v109_v43 = vmul.f32 %v541_v42, %v799_v9 }
 0x191   :  { %v117_v47 = vmul.f32 %v432_v44, %v109_v43 }
 0x192   :  { %v543_v45 = vpop.eup %542 }
 0x193   :  { %v110_v46 = vmul.f32 %v543_v45, %v803_v13  ;;  %v125_v50 = vadd.f32 %v433_v48, %v117_v47 }
 0x195   :  { %v118_v49 = vmul.f32 %v432_v44, %v110_v46 }
 0x197   :  { %v126_v51 = vadd.f32 %v433_v48, %v118_v49 }
 0x199   :  { %v127_v52 = vpack.c.bf16 %v126_v51, %v125_v50 }
 0x19b   :  { %338 = vmatmul.mubr.bf16.vlgmr.msra.gmra.mrb[0].mxu0 %v127_v52  ;;  %492 = vmatmul.mubr.bf16.vlgmr.msra.gmra.mrb[0].mxu1 %v127_v52 }
 0x26e   :  { %v339_v62 = vpop.f32.mrb[0].mxu0  ;;  %v382_v63 = vpop.f32.mrb[0].mxu1 }
 0x26f   :  { %v340_v0 = vadd.f32 %v339_v62, %v165_v59  ;;  %v383_v1 = vadd.f32 %v382_v63, %v173_v60  ;;  %v341_v2 = vpop.f32.mrb[1].mxu0  ;;  %v493_v3 = vpop.f32.mrb[1].mxu1 }
 0x270   :  { %v342_v4 = vadd.f32 %v341_v2, %v169_v61  ;;  %v343_v5 = vpop.f32.mrb[2].mxu0  ;;  %v385_v6 = vpop.f32.mrb[2].mxu1 }
 0x271   :  { %v463_v7 = vpack.c.bf16 %v383_v1, %v383_v1  ;;  %v344_v8 = vadd.f32 %v343_v5, %v165_v59  ;;  %v386_v9 = vadd.f32 %v385_v6, %v173_v60  ;;  %v345_v10 = vpop.f32.mrb[3].mxu0  ;;  %v494_v11 = vpop.f32.mrb[3].mxu1 }
 0x272   :  { %v462_v12 = vpack.c.bf16 %v342_v4, %v340_v0  ;;  %v346_v13 = vadd.f32 %v345_v10, %v169_v61 }
 0x273   :  { %410 = vst [vmem:[#allocation11 + $0x8] sm:$0xf] %v463_v7  ;;  %v465_v14 = vpack.c.bf16 %v386_v9, %v386_v9 }
 0x274   :  { %409 = vst [vmem:[#allocation11] sm:$0xff] %v462_v12  ;;  %v464_v15 = vpack.c.bf16 %v346_v13, %v344_v8 }
 0x275   :  { %412 = vst [vmem:[#allocation11 + $0x14] sm:$0xf] %v465_v14 }
 0x276   :  { %411 = vst [vmem:[#allocation11 + $0xc] sm:$0xff] %v464_v15 }
 0x277   :  { %665 = shalt.err (!%p662_p2)
}
 0x278   :  { %s666_s10 = scalar_lea.hbm %s836_s5, 384 }
 0x279   :  { %p667_p3 = scmp.ne.s32.totalorder %s836_s5, %s666_s10  ;;  %p670_p4 = scmp.lt.u32.totalorder %s666_s10, %s836_s5 }
 0x27b   :  { %p672_p5 = pnand %p670_p4, %p667_p3 }
 0x27d   :  { %675 = shalt.err (!%p672_p5)
}
 0x27e   :  { %424 = dma.vmem_to_hbm [thread:$0]  %s419_s6, 384, %s836_s5, [#allocation4], %s686_s1, %s686_s1, %s687_s16  }
 0x27f   :  { %682 = dma.done.wait [#allocation4], 384  }
 0x280   :  { %683 = vsyncadd [#allocation4], 4294966912 }
 0x281   :  { %428 = vsyncpa [#allocation3], 1 }
 0x282   :  { %429 = vsyncpa [#allocation6], 1 }
 0x283   :  { %430 = vsyncpa [#allocation9], 1 }
 0x284   :  { %431 = vsyncpa [#allocation4], 1 }

// kernel: _lambda_.8
= control target key start
LH: loop header
LB: loop body
LE: loop exit
PB: predicated region body
PF: predicated region fallthrough
CT: control target
= control target key end

     0   :  { %8 = vsyncpa [#allocation3], 0  ;;  %s1495_s0 = inlined_call_operand.hbm [shape: bf16[8,8,32], index: 0, kind: input, shape index: {}]   ;;  %s1496_s1 = inlined_call_operand.hbm [shape: bf16[8,8,32], index: 1, kind: input, shape index: {}]   ;;  %s1497_s2 = inlined_call_operand.hbm [shape: bf16[8,8,32], index: 2, kind: input, shape index: {}]   ;;  %s1498_s3 = inlined_call_operand.hbm [shape: bf16[8,8,32], index: 3, kind: output, shape index: {}]  }
   0x1   :  { %9 = vsyncpa [#allocation6], 0 }
   0x2   :  { %10 = vsyncpa [#allocation4], 0  ;;  %s1252_s12 = smov [#allocation5]   ;;  %s1253_s14 = smov [#allocation2]  }
   0x3   :  { %s28_s13 = sshll.u32 %s1252_s12, 4  ;;  %s16_s15 = sshll.u32 %s1253_s14, 4  ;;  %s29_s13 = int_to_ptr.vmem [resolvable:$true] %s28_s13  ;;  %s1280_s15 = int_to_ptr.vmem [resolvable:$true] %s16_s15 }
   0x4   :  { %s1158_s18 = scalar_lea.hbm %s1496_s1, 512 }
   0x5   :  { %p1159_p0 = scmp.ne.s32.totalorder %s1496_s1, %s1158_s18  ;;  %p1162_p1 = scmp.lt.u32.totalorder %s1158_s18, %s1496_s1 }
   0x7   :  { %p1164_p2 = pnand %p1162_p1, %p1159_p0 }
   0x9   :  { %1167 = shalt.err (!%p1164_p2)
}
   0xa   :  { %s1168_s23 = scalar_lea.vmem %s29_s13, 512  ;;  %p1173_p4 = scmp.lt.s32.totalorder %s29_s13, %s29_s13 }
   0xb   :  { %p1169_p3 = scmp.ne.s32.totalorder %s29_s13, %s1168_s23  ;;  %p1174_p5 = scmp.lt.s32.totalorder %s1168_s23, %s1168_s23 }
   0xd   :  { %p1175_p6 = por %p1174_p5, %p1173_p4 }
   0xf   :  { %p1176_p7 = pnand %p1175_p6, %p1169_p3 }
  0x11   :  { %1179 = shalt.err (!%p1176_p7)
}
  0x12   :  { %s1254_s24 = smov 64   ;;  %s1255_s25 = smov 4  }
  0x13   :  { %34 = dma.hbm_to_vmem [thread:$0]  %s1496_s1, 512, %s29_s13, [#allocation6], %s1254_s24, %s1254_s24, %s1255_s25  }
  0x14   :  { %s1180_s30 = scalar_lea.hbm %s1495_s0, 512 }
  0x15   :  { %p1181_p8 = scmp.ne.s32.totalorder %s1495_s0, %s1180_s30  ;;  %p1184_p9 = scmp.lt.u32.totalorder %s1180_s30, %s1495_s0 }
  0x17   :  { %p1186_p10 = pnand %p1184_p9, %p1181_p8 }
  0x19   :  { %1189 = shalt.err (!%p1186_p10)
}
  0x1a   :  { %s1190_s8 = scalar_lea.vmem %s1280_s15, 512  ;;  %p1195_p12 = scmp.lt.s32.totalorder %s1280_s15, %s1280_s15 }
  0x1b   :  { %p1191_p11 = scmp.ne.s32.totalorder %s1280_s15, %s1190_s8  ;;  %p1196_p13 = scmp.lt.s32.totalorder %s1190_s8, %s1190_s8 }
  0x1d   :  { %p1197_p0 = por %p1196_p13, %p1195_p12 }
  0x1f   :  { %p1198_p1 = pnand %p1197_p0, %p1191_p11 }
  0x21   :  { %1201 = shalt.err (!%p1198_p1)
}
  0x22   :  { %22 = dma.hbm_to_vmem [thread:$0]  %s1495_s0, 512, %s1280_s15, [#allocation3], %s1254_s24, %s1254_s24, %s1255_s25  }
  0x23   :  { %s1256_s10 = smov [#allocation7]   ;;  %s1202_s14 = scalar_lea.hbm %s1497_s2, 512 }
  0x24   :  { %s40_s11 = sshll.u32 %s1256_s10, 4  ;;  %p1203_p2 = scmp.ne.s32.totalorder %s1497_s2, %s1202_s14  ;;  %s41_s11 = int_to_ptr.vmem [resolvable:$true] %s40_s11 }
  0x25   :  { %p1206_p3 = scmp.lt.u32.totalorder %s1202_s14, %s1497_s2 }
  0x27   :  { %p1208_p4 = pnand %p1206_p3, %p1203_p2 }
  0x29   :  { %1211 = shalt.err (!%p1208_p4)
}
  0x2a   :  { %s1212_s20 = scalar_lea.vmem %s41_s11, 512  ;;  %p1217_p6 = scmp.lt.s32.totalorder %s41_s11, %s41_s11 }
  0x2b   :  { %p1213_p5 = scmp.ne.s32.totalorder %s41_s11, %s1212_s20  ;;  %p1218_p7 = scmp.lt.s32.totalorder %s1212_s20, %s1212_s20 }
  0x2d   :  { %p1219_p8 = por %p1218_p7, %p1217_p6 }
  0x2f   :  { %p1220_p9 = pnand %p1219_p8, %p1213_p5 }
  0x31   :  { %1223 = shalt.err (!%p1220_p9)
}
  0x32   :  { %46 = dma.hbm_to_vmem [thread:$0]  %s1497_s2, 512, %s41_s11, [#allocation6], %s1254_s24, %s1254_s24, %s1255_s25  }
  0x33   :  { %1246 = dma.done.wait [#allocation3], 512  }
  0x34   :  { %1247 = vsyncadd [#allocation3], 4294966784 }
  0x35   :  { %1248 = dma.done.wait [#allocation6], 1024  }
  0x36   :  { %1249 = vsyncadd [#allocation6], 4294966272  ;;  %v1257_v0 = vmov 0.0   ;;  %vm1258_vm0 = vmmov 0   ;;  %vm81_vm1 = vcmask 261120   ;;  %v458_v25 = vlaneseq  ;;  %s1259_s2 = smov [#allocation8]  }
  0x37   :  { %1022 = vmatprep.subr.bf16.mxu0 %v1257_v0  ;;  %1028 = vmatprep.subr.bf16.mxu1 %v1257_v0  ;;  %v65_v1 = vld [vmem:[#allocation5] sm:$0xf]  ;;  %v66_v2 = vld [vmem:[#allocation5 + $0x4] sm:$0xf]  ;;  %v67_v5 = vld [vmem:[#allocation5 + $0x8] sm:$0xf] }
  0x38   :  { %1024 = vmatprep.mubr.msk.bf16.mxu0 %vm1258_vm0, %v1257_v0  ;;  %1030 = vmatprep.mubr.msk.bf16.mxu1 %vm1258_vm0, %v1257_v0  ;;  %v86_v3 = vsel %vm81_vm1, %v65_v1, 0  ;;  %v132_v4 = vsel %vm81_vm1, %v66_v2, 0  ;;  %v68_v6 = vld [vmem:[#allocation5 + $0xc] sm:$0xf]  ;;  %v57_v7 = vld [vmem:[#allocation2] sm:$0xf] }
  0x39   :  { %1023 = vmatpush3.bf16.xpose.msra.mxu0 %v86_v3  ;;  %1029 = vmatpush3.bf16.xpose.msra.mxu1 %v132_v4  ;;  %v58_v8 = vld [vmem:[#allocation2 + $0x4] sm:$0xf]  ;;  %v178_v9 = vsel %vm81_vm1, %v67_v5, 0  ;;  %v224_v10 = vsel %vm81_vm1, %v68_v6, 0  ;;  %v69_v11 = vld [vmem:[#allocation5 + $0x10] sm:$0xf] }
  0x3a   :  { %1034 = vmatprep.subr.bf16.mxu0 %v1257_v0  ;;  %1040 = vmatprep.subr.bf16.mxu1 %v1257_v0  ;;  %v70_v12 = vld [vmem:[#allocation5 + $0x14] sm:$0xf]  ;;  %v59_v13 = vld [vmem:[#allocation2 + $0x8] sm:$0xf]  ;;  %v60_v14 = vld [vmem:[#allocation2 + $0xc] sm:$0xf] }
  0x3b   :  { %v270_v15 = vsel %vm81_vm1, %v69_v11, 0  ;;  %v316_v16 = vsel %vm81_vm1, %v70_v12, 0  ;;  %v71_v17 = vld [vmem:[#allocation5 + $0x18] sm:$0xf]  ;;  %v72_v18 = vld [vmem:[#allocation5 + $0x1c] sm:$0xf] }
  0x3c   :  { %v61_v19 = vld [vmem:[#allocation2 + $0x10] sm:$0xf]  ;;  %v62_v20 = vld [vmem:[#allocation2 + $0x14] sm:$0xf]  ;;  %v362_v21 = vsel %vm81_vm1, %v71_v17, 0  ;;  %v408_v22 = vsel %vm81_vm1, %v72_v18, 0 }
  0x3d   :  { %v63_v23 = vld [vmem:[#allocation2 + $0x18] sm:$0xf]  ;;  %v64_v24 = vld [vmem:[#allocation2 + $0x1c] sm:$0xf]  ;;  %v459_v26 = vshrl.u32 %v458_v25, 7  ;;  %v461_v27 = vand.u32 127, %v458_v25 }
  0x3e   :  { %vm473_vm3 = vcmask 64512   ;;  %vm573_vm4 = vcmask 1043456   ;;  %vm947_vm5 = vcmask 257024   ;;  %s961_s21 = sshll.u32 %s1259_s2, 4  ;;  %s962_s21 = int_to_ptr.vmem [resolvable:$true] %s961_s21 }
  0x3f   :  { %vm1378_vm2 = vcmp.ge.s32.totalorder %v459_v26, %v461_v27  ;;  %s1224_s22 = scalar_lea.vmem %s962_s21, 512  ;;  %p1229_p11 = scmp.lt.s32.totalorder %s962_s21, %s962_s21 }
  0x40   :  { %1025 = vmatmul.mubr.msk.bf16.vlgmr.msra.gmra.mrb[0].mxu0 %vm81_vm1, %v57_v7  ;;  %1031 = vmatmul.mubr.msk.bf16.vlgmr.msra.gmra.mrb[0].mxu1 %vm81_vm1, %v58_v8  ;;  %p1225_p10 = scmp.ne.s32.totalorder %s962_s21, %s1224_s22  ;;  %p1230_p12 = scmp.lt.s32.totalorder %s1224_s22, %s1224_s22 }
  0x41   :  { %1035 = vmatpush3.bf16.xpose.msra.mxu0 %v178_v9  ;;  %1041 = vmatpush3.bf16.xpose.msra.mxu1 %v224_v10 }
  0x42   :  { %1036 = vmatprep.mubr.msk.bf16.mxu0 %vm1258_vm0, %v1257_v0  ;;  %1042 = vmatprep.mubr.msk.bf16.mxu1 %vm1258_vm0, %v1257_v0  ;;  %p1231_p13 = por %p1230_p12, %p1229_p11 }
  0x43   :  { %1046 = vmatprep.subr.bf16.mxu0 %v1257_v0  ;;  %1052 = vmatprep.subr.bf16.mxu1 %v1257_v0 }
  0x44   :  { %p1232_p0 = pnand %p1231_p13, %p1225_p10 }
  0x48   :  { %1037 = vmatmul.mubr.msk.bf16.vlgmr.msra.gmra.mrb[4].mxu0 %vm81_vm1, %v59_v13  ;;  %1043 = vmatmul.mubr.msk.bf16.vlgmr.msra.gmra.mrb[4].mxu1 %vm81_vm1, %v60_v14 }
  0x49   :  { %1047 = vmatpush3.bf16.xpose.msra.mxu0 %v270_v15  ;;  %1053 = vmatpush3.bf16.xpose.msra.mxu1 %v316_v16 }
  0x4a   :  { %1048 = vmatprep.mubr.msk.bf16.mxu0 %vm1258_vm0, %v1257_v0  ;;  %1054 = vmatprep.mubr.msk.bf16.mxu1 %vm1258_vm0, %v1257_v0 }
  0x4b   :  { %1058 = vmatprep.subr.bf16.mxu0 %v1257_v0  ;;  %1064 = vmatprep.subr.bf16.mxu1 %v1257_v0 }
  0x50   :  { %1049 = vmatmul.mubr.msk.bf16.vlgmr.msra.gmra.mrb[8].mxu0 %vm81_vm1, %v61_v19  ;;  %1055 = vmatmul.mubr.msk.bf16.vlgmr.msra.gmra.mrb[8].mxu1 %vm81_vm1, %v62_v20 }
  0x51   :  { %1059 = vmatpush3.bf16.xpose.msra.mxu0 %v362_v21  ;;  %1065 = vmatpush3.bf16.xpose.msra.mxu1 %v408_v22 }
  0x52   :  { %1060 = vmatprep.mubr.msk.bf16.mxu0 %vm1258_vm0, %v1257_v0  ;;  %1066 = vmatprep.mubr.msk.bf16.mxu1 %vm1258_vm0, %v1257_v0 }
  0x53   :  { %1070 = vmatprep.subr.bf16.mxu0 %v1257_v0  ;;  %1076 = vmatprep.subr.bf16.mxu1 %v1257_v0 }
  0x58   :  { %1061 = vmatmul.mubr.msk.bf16.vlgmr.msra.gmra.mrb[12].mxu0 %vm81_vm1, %v63_v23  ;;  %1067 = vmatmul.mubr.msk.bf16.vlgmr.msra.gmra.mrb[12].mxu1 %vm81_vm1, %v64_v24 }
  0x59   :  { %1072 = vmatprep.mubr.msk.bf16.mxu0 %vm1258_vm0, %v1257_v0  ;;  %1078 = vmatprep.mubr.msk.bf16.mxu1 %vm1258_vm0, %v1257_v0 }
 0x113   :  { %v122_v28 = vpop.f32.mrb[0].mxu0  ;;  %v168_v29 = vpop.f32.mrb[0].mxu1 }
 0x114   :  { %v450_v31 = vmul.f32 0.17677669, %v122_v28  ;;  %v1026_v32 = vpop.f32.mrb[1].mxu0  ;;  %v451_v33 = vmul.f32 0.17677669, %v168_v29  ;;  %v1032_v34 = vpop.f32.mrb[1].mxu1 }
 0x115   :  { %v125_v35 = vpop.f32.mrb[2].mxu0  ;;  %v171_v36 = vpop.f32.mrb[2].mxu1 }
 0x116   :  { %v1027_v37 = vpop.f32.mrb[3].mxu0  ;;  %v1033_v38 = vpop.f32.mrb[3].mxu1  ;;  %v465_v39 = vsel %vm1378_vm2, %v450_v31, -1e+30  ;;  %v466_v40 = vsel %vm1378_vm2, %v451_v33, -1e+30 }
 0x117   :  { %v474_v41 = vsel %vm473_vm3, %v465_v39, -inf  ;;  %v477_v42 = vsel %vm473_vm3, %v466_v40, -inf }
 0x118   :  { %475 = vmax.xlane.f32.xlu0 %v474_v41 }
 0x11b   :  { %v214_v43 = vpop.f32.mrb[4].mxu0  ;;  %v260_v44 = vpop.f32.mrb[4].mxu1 }
 0x11c   :  { %v452_v45 = vmul.f32 0.17677669, %v214_v43  ;;  %478 = vmax.xlane.f32.xlu0 %v477_v42  ;;  %v1038_v46 = vpop.f32.mrb[5].mxu0  ;;  %v453_v47 = vmul.f32 0.17677669, %v260_v44  ;;  %v1044_v48 = vpop.f32.mrb[5].mxu1 }
 0x11d   :  { %v217_v49 = vpop.f32.mrb[6].mxu0  ;;  %v263_v50 = vpop.f32.mrb[6].mxu1 }
 0x11e   :  { %v1039_v51 = vpop.f32.mrb[7].mxu0  ;;  %v1045_v52 = vpop.f32.mrb[7].mxu1  ;;  %v467_v53 = vsel %vm1378_vm2, %v452_v45, -1e+30  ;;  %v468_v54 = vsel %vm1378_vm2, %v453_v47, -1e+30 }
 0x11f   :  { %v480_v55 = vsel %vm473_vm3, %v467_v53, -inf  ;;  %v483_v56 = vsel %vm473_vm3, %v468_v54, -inf }
 0x120   :  { %481 = vmax.xlane.f32.xlu1 %v480_v55 }
 0x123   :  { %v306_v57 = vpop.f32.mrb[8].mxu0  ;;  %v352_v58 = vpop.f32.mrb[8].mxu1 }
 0x124   :  { %v454_v59 = vmul.f32 0.17677669, %v306_v57  ;;  %v455_v60 = vmul.f32 0.17677669, %v352_v58  ;;  %484 = vmax.xlane.f32.xlu1 %v483_v56  ;;  %v1050_v61 = vpop.f32.mrb[9].mxu0  ;;  %v1056_v62 = vpop.f32.mrb[9].mxu1 }
 0x125   :  { %v309_v63 = vpop.f32.mrb[10].mxu0  ;;  %v355_v1 = vpop.f32.mrb[10].mxu1  ;;  %v73_v62 = vld [vmem:[#allocation7] sm:$0xf] }
 0x126   :  { %v1057_v2 = vpop.f32.mrb[11].mxu1  ;;  %v470_v3 = vsel %vm1378_vm2, %v455_v60, -1e+30  ;;  %v469_v4 = vsel %vm1378_vm2, %v454_v59, -1e+30  ;;  %v1051_v5 = vpop.f32.mrb[11].mxu0 }
 0x127   :  { %v489_v6 = vsel %vm473_vm3, %v470_v3, -inf  ;;  %v486_v7 = vsel %vm473_vm3, %v469_v4, -inf  ;;  %v575_v63 = vsel %vm573_vm4, %v73_v62, 0  ;;  %v74_v1 = vld [vmem:[#allocation7 + $0x4] sm:$0xf] }
 0x128   :  { %490 = vmax.xlane.f32.xlu1 %v489_v6  ;;  %487 = vmax.xlane.f32.xlu0 %v486_v7  ;;  %v621_v2 = vsel %vm573_vm4, %v74_v1, 0  ;;  %v75_v7 = vld [vmem:[#allocation7 + $0x8] sm:$0xf] }
 0x129   :  { %1071 = vmatpush3.bf16.msra.mxu0 %v575_v63  ;;  %1077 = vmatpush3.bf16.msra.mxu1 %v621_v2 }
 0x12a   :  { %1082 = vmatprep.subr.bf16.mxu0 %v1257_v0  ;;  %1088 = vmatprep.subr.bf16.mxu1 %v1257_v0 }
 0x12b   :  { %v398_v8 = vpop.f32.mrb[12].mxu0  ;;  %v444_v9 = vpop.f32.mrb[12].mxu1 }
 0x12c   :  { %v456_v10 = vmul.f32 0.17677669, %v398_v8  ;;  %v457_v11 = vmul.f32 0.17677669, %v444_v9  ;;  %v1062_v12 = vpop.f32.mrb[13].mxu0  ;;  %v1068_v13 = vpop.f32.mrb[13].mxu1 }
 0x12d   :  { %v401_v14 = vpop.f32.mrb[14].mxu0  ;;  %v447_v15 = vpop.f32.mrb[14].mxu1  ;;  %v76_v13 = vld [vmem:[#allocation7 + $0xc] sm:$0xf] }
 0x12e   :  { %v1069_v16 = vpop.f32.mrb[15].mxu1  ;;  %v472_v17 = vsel %vm1378_vm2, %v457_v11, -1e+30  ;;  %v471_v18 = vsel %vm1378_vm2, %v456_v10, -1e+30  ;;  %v1063_v19 = vpop.f32.mrb[15].mxu0 }
 0x12f   :  { %v495_v20 = vsel %vm473_vm3, %v472_v17, -inf  ;;  %v492_v21 = vsel %vm473_vm3, %v471_v18, -inf  ;;  %v667_v11 = vsel %vm573_vm4, %v75_v7, 0 }
 0x130   :  { %496 = vmax.xlane.f32.xlu1 %v495_v20  ;;  %493 = vmax.xlane.f32.xlu0 %v492_v21  ;;  %v77_v20 = vld [vmem:[#allocation7 + $0x10] sm:$0xf] }
 0x1a5   :  { %v476_v22 = vpop.xlane.xlu0 %475 }
 0x1a6   :  { %v498_v23 = vsub.f32 %v465_v39, %v476_v22 }
 0x1a8   :  { %v506_v24 = vmul.f32 1.442695, %v498_v23  ;;  %v759_v23 = vsel %vm573_vm4, %v77_v20, 0 }
 0x1a9   :  { %v479_v25 = vpop.xlane.xlu0 %478 }
 0x1aa   :  { %1126 = vpow2.f32 %v506_v24  ;;  %v499_v26 = vsub.f32 %v466_v40, %v479_v25  ;;  %v78_v25 = vld [vmem:[#allocation7 + $0x14] sm:$0xf] }
 0x1ac   :  { %v508_v27 = vmul.f32 1.442695, %v499_v26 }
 0x1ad   :  { %v482_v28 = vpop.xlane.xlu1 %481 }
 0x1ae   :  { %1128 = vpow2.f32 %v508_v27  ;;  %v500_v29 = vsub.f32 %v467_v53, %v482_v28 }
 0x1b0   :  { %v510_v31 = vmul.f32 1.442695, %v500_v29 }
 0x1b1   :  { %v485_v30 = vpop.xlane.xlu1 %484 }
 0x1b2   :  { %1130 = vpow2.f32 %v510_v31  ;;  %v501_v32 = vsub.f32 %v468_v54, %v485_v30  ;;  %v805_v31 = vsel %vm573_vm4, %v78_v25, 0 }
 0x1b4   :  { %v1127_v33 = vpop.eup %1126  ;;  %v512_v34 = vmul.f32 1.442695, %v501_v32 }
 0x1b5   :  { %v491_v35 = vpop.xlane.xlu1 %490  ;;  %v488_v36 = vpop.xlane.xlu0 %487  ;;  %v522_v37 = vsel %vm473_vm3, %v1127_v33, 0.0 }
 0x1b6   :  { %1132 = vpow2.f32 %v512_v34  ;;  %v503_v38 = vsub.f32 %v470_v3, %v491_v35  ;;  %v502_v39 = vsub.f32 %v469_v4, %v488_v36  ;;  %523 = vadd.xlane.f32.xlu0 %v522_v37 }
 0x1b8   :  { %v1129_v41 = vpop.eup %1128  ;;  %v516_v40 = vmul.f32 1.442695, %v503_v38  ;;  %v514_v42 = vmul.f32 1.442695, %v502_v39  ;;  %v80_v38 = vld [vmem:[#allocation7 + $0x1c] sm:$0xf] }
 0x1b9   :  { %v525_v43 = vsel %vm473_vm3, %v1129_v41, 0.0 }
 0x1ba   :  { %1134 = vpow2.f32 %v516_v40  ;;  %526 = vadd.xlane.f32.xlu1 %v525_v43 }
 0x1bb   :  { %1136 = vpow2.f32 %v514_v42 }
 0x1bc   :  { %v1408_v44 = vpop.eup %1130 }
 0x1bd   :  { %v497_v45 = vpop.xlane.xlu1 %496  ;;  %v494_v46 = vpop.xlane.xlu0 %493  ;;  %v528_v47 = vsel %vm473_vm3, %v1408_v44, 0.0 }
 0x1be   :  { %v505_v48 = vsub.f32 %v472_v17, %v497_v45  ;;  %v504_v49 = vsub.f32 %v471_v18, %v494_v46  ;;  %529 = vadd.xlane.f32.xlu0 %v528_v47  ;;  %v713_v18 = vsel %vm573_vm4, %v76_v13, 0 }
 0x1c0   :  { %v1412_v50 = vpop.eup %1132  ;;  %v520_v51 = vmul.f32 1.442695, %v505_v48  ;;  %v518_v52 = vmul.f32 1.442695, %v504_v49 }
 0x1c1   :  { %v531_v53 = vsel %vm473_vm3, %v1412_v50, 0.0 }
 0x1c2   :  { %1138 = vpow2.f32 %v520_v51  ;;  %532 = vadd.xlane.f32.xlu1 %v531_v53 }
 0x1c3   :  { %1140 = vpow2.f32 %v518_v52 }
 0x1c4   :  { %v1416_v54 = vpop.eup %1134 }
 0x1c5   :  { %v1418_v55 = vpop.eup %1136  ;;  %v537_v56 = vsel %vm473_vm3, %v1416_v54, 0.0 }
 0x1c6   :  { %538 = vadd.xlane.f32.xlu1 %v537_v56  ;;  %v534_v57 = vsel %vm473_vm3, %v1418_v55, 0.0 }
 0x1c7   :  { %535 = vadd.xlane.f32.xlu0 %v534_v57 }
 0x1cc   :  { %v1424_v58 = vpop.eup %1138 }
 0x1cd   :  { %v1426_v59 = vpop.eup %1140  ;;  %v543_v60 = vsel %vm473_vm3, %v1424_v58, 0.0 }
 0x1ce   :  { %544 = vadd.xlane.f32.xlu1 %v543_v60  ;;  %v540_v61 = vsel %vm473_vm3, %v1426_v59, 0.0 }
 0x1cf   :  { %541 = vadd.xlane.f32.xlu0 %v540_v61 }
 0x243   :  { %v524_v3 = vpop.xlane.xlu0 %523 }
 0x244   :  { %1142 = vrcp.f32 %v524_v3 }
 0x247   :  { %v527_v4 = vpop.xlane.xlu1 %526 }
 0x248   :  { %1144 = vrcp.f32 %v527_v4 }
 0x24b   :  { %v530_v5 = vpop.xlane.xlu0 %529 }
 0x24c   :  { %1146 = vrcp.f32 %v530_v5 }
 0x24e   :  { %v1143_v6 = vpop.eup %1142 }
 0x24f   :  { %v554_v8 = vmul.f32 %v1143_v6, %v1127_v33  ;;  %v533_v9 = vpop.xlane.xlu1 %532  ;;  %v79_v33 = vld [vmem:[#allocation7 + $0x18] sm:$0xf] }
 0x250   :  { %1148 = vrcp.f32 %v533_v9  ;;  %v851_v37 = vsel %vm573_vm4, %v79_v33, 0 }
 0x251   :  { %v562_v10 = vpack.c.bf16 %v554_v8, %v554_v8 }
 0x252   :  { %v1145_v12 = vpop.eup %1144 }
 0x253   :  { %v555_v14 = vmul.f32 %v1145_v12, %v1129_v41  ;;  %v539_v15 = vpop.xlane.xlu1 %538  ;;  %1073 = vmatmul.mubr.msk.bf16.vlgmr.msra.gmra.mrb[16].mxu0 %vm473_vm3, %v562_v10  ;;  %v897_v41 = vsel %vm573_vm4, %v80_v38, 0 }
 0x254   :  { %1150 = vrcp.f32 %v539_v15  ;;  %v536_v16 = vpop.xlane.xlu0 %535  ;;  %1083 = vmatpush3.bf16.msra.mxu0 %v667_v11  ;;  %1084 = vmatprep.mubr.msk.bf16.mxu0 %vm1258_vm0, %v1257_v0 }
 0x255   :  { %1152 = vrcp.f32 %v536_v16  ;;  %v563_v17 = vpack.c.bf16 %v555_v14, %v555_v14  ;;  %1094 = vmatprep.subr.bf16.mxu0 %v1257_v0 }
 0x256   :  { %v1147_v19 = vpop.eup %1146 }
 0x257   :  { %v556_v21 = vmul.f32 %v1147_v19, %v1408_v44  ;;  %1079 = vmatmul.mubr.msk.bf16.vlgmr.msra.gmra.mrb[16].mxu1 %vm473_vm3, %v563_v17 }
 0x258   :  { %1089 = vmatpush3.bf16.msra.mxu1 %v713_v18  ;;  %1090 = vmatprep.mubr.msk.bf16.mxu1 %vm1258_vm0, %v1257_v0 }
 0x259   :  { %v564_v22 = vpack.c.bf16 %v556_v21, %v556_v21  ;;  %1100 = vmatprep.subr.bf16.mxu1 %v1257_v0 }
 0x25a   :  { %v1149_v24 = vpop.eup %1148 }
 0x25b   :  { %v557_v26 = vmul.f32 %v1149_v24, %v1412_v50  ;;  %v545_v27 = vpop.xlane.xlu1 %544  ;;  %1085 = vmatmul.mubr.msk.bf16.vlgmr.msra.gmra.mrb[20].mxu0 %vm473_vm3, %v564_v22 }
 0x25c   :  { %1154 = vrcp.f32 %v545_v27  ;;  %v542_v28 = vpop.xlane.xlu0 %541  ;;  %1095 = vmatpush3.bf16.msra.mxu0 %v759_v23  ;;  %1096 = vmatprep.mubr.msk.bf16.mxu0 %vm1258_vm0, %v1257_v0 }
 0x25d   :  { %1156 = vrcp.f32 %v542_v28  ;;  %v565_v29 = vpack.c.bf16 %v557_v26, %v557_v26  ;;  %1106 = vmatprep.subr.bf16.mxu0 %v1257_v0 }
 0x25e   :  { %v1151_v30 = vpop.eup %1150 }
 0x25f   :  { %v1153_v32 = vpop.eup %1152  ;;  %1091 = vmatmul.mubr.msk.bf16.vlgmr.msra.gmra.mrb[20].mxu1 %vm473_vm3, %v565_v29  ;;  %v559_v35 = vmul.f32 %v1151_v30, %v1416_v54 }
 0x260   :  { %v558_v34 = vmul.f32 %v1153_v32, %v1418_v55  ;;  %1101 = vmatpush3.bf16.msra.mxu1 %v805_v31  ;;  %1102 = vmatprep.mubr.msk.bf16.mxu1 %vm1258_vm0, %v1257_v0 }
 0x261   :  { %1112 = vmatprep.subr.bf16.mxu1 %v1257_v0  ;;  %v567_v39 = vpack.c.bf16 %v559_v35, %v559_v35 }
 0x262   :  { %v566_v36 = vpack.c.bf16 %v558_v34, %v558_v34 }
 0x264   :  { %1097 = vmatmul.mubr.msk.bf16.vlgmr.msra.gmra.mrb[24].mxu0 %vm473_vm3, %v566_v36 }
 0x265   :  { %1107 = vmatpush3.bf16.msra.mxu0 %v851_v37  ;;  %1108 = vmatprep.mubr.msk.bf16.mxu0 %vm1258_vm0, %v1257_v0 }
 0x266   :  { %v1155_v40 = vpop.eup %1154 }
 0x267   :  { %v1157_v42 = vpop.eup %1156  ;;  %1103 = vmatmul.mubr.msk.bf16.vlgmr.msra.gmra.mrb[24].mxu1 %vm473_vm3, %v567_v39  ;;  %v561_v44 = vmul.f32 %v1155_v40, %v1424_v58 }
 0x268   :  { %v560_v43 = vmul.f32 %v1157_v42, %v1426_v59  ;;  %1113 = vmatpush3.bf16.msra.mxu1 %v897_v41  ;;  %1114 = vmatprep.mubr.msk.bf16.mxu1 %vm1258_vm0, %v1257_v0 }
 0x269   :  { %v569_v46 = vpack.c.bf16 %v561_v44, %v561_v44 }
 0x26a   :  { %v568_v45 = vpack.c.bf16 %v560_v43, %v560_v43 }
 0x26c   :  { %1109 = vmatmul.mubr.msk.bf16.vlgmr.msra.gmra.mrb[28].mxu0 %vm473_vm3, %v568_v45 }
 0x26f   :  { %1115 = vmatmul.mubr.msk.bf16.vlgmr.msra.gmra.mrb[28].mxu1 %vm473_vm3, %v569_v46 }
 0x326   :  { %v611_v47 = vpop.f32.mrb[16].mxu0 }
 0x327   :  { %v939_v48 = vpack.c.bf16 %v611_v47, %v611_v47  ;;  %v1074_v49 = vpop.f32.mrb[17].mxu0 }
 0x328   :  { %v614_v50 = vpop.f32.mrb[18].mxu0 }
 0x329   :  { %948 = vst.msk [vmem:[#allocation8] sm:$0xf] %vm947_vm5, %v939_v48  ;;  %v1075_v51 = vpop.f32.mrb[19].mxu0 }
 0x32a   :  { %v657_v52 = vpop.f32.mrb[16].mxu1 }
 0x32b   :  { %v940_v53 = vpack.c.bf16 %v657_v52, %v657_v52  ;;  %v1080_v54 = vpop.f32.mrb[17].mxu1 }
 0x32c   :  { %v660_v0 = vpop.f32.mrb[18].mxu1 }
 0x32d   :  { %949 = vst.msk [vmem:[#allocation8 + $0x4] sm:$0xf] %vm947_vm5, %v940_v53  ;;  %v1081_v55 = vpop.f32.mrb[19].mxu1 }
 0x32e   :  { %v703_v56 = vpop.f32.mrb[20].mxu0 }
 0x32f   :  { %v941_v57 = vpack.c.bf16 %v703_v56, %v703_v56  ;;  %v1086_v58 = vpop.f32.mrb[21].mxu0 }
 0x330   :  { %v706_v59 = vpop.f32.mrb[22].mxu0 }
 0x331   :  { %950 = vst.msk [vmem:[#allocation8 + $0x8] sm:$0xf] %vm947_vm5, %v941_v57  ;;  %v1087_v60 = vpop.f32.mrb[23].mxu0 }
 0x332   :  { %v749_v61 = vpop.f32.mrb[20].mxu1 }
 0x333   :  { %v942_v62 = vpack.c.bf16 %v749_v61, %v749_v61  ;;  %v1092_v63 = vpop.f32.mrb[21].mxu1 }
 0x334   :  { %v752_v1 = vpop.f32.mrb[22].mxu1 }
 0x335   :  { %951 = vst.msk [vmem:[#allocation8 + $0xc] sm:$0xf] %vm947_vm5, %v942_v62  ;;  %v1093_v2 = vpop.f32.mrb[23].mxu1 }
 0x337   :  { %v795_v3 = vpop.f32.mrb[24].mxu0 }
 0x338   :  { %v943_v4 = vpack.c.bf16 %v795_v3, %v795_v3  ;;  %v1098_v5 = vpop.f32.mrb[25].mxu0 }
 0x339   :  { %v798_v6 = vpop.f32.mrb[26].mxu0 }
 0x33a   :  { %952 = vst.msk [vmem:[#allocation8 + $0x10] sm:$0xf] %vm947_vm5, %v943_v4  ;;  %v1099_v7 = vpop.f32.mrb[27].mxu0  ;;  %v841_v8 = vpop.f32.mrb[24].mxu1 }
 0x33b   :  { %v944_v9 = vpack.c.bf16 %v841_v8, %v841_v8  ;;  %v1104_v10 = vpop.f32.mrb[25].mxu1 }
 0x33c   :  { %v844_v11 = vpop.f32.mrb[26].mxu1 }
 0x33d   :  { %953 = vst.msk [vmem:[#allocation8 + $0x14] sm:$0xf] %vm947_vm5, %v944_v9  ;;  %v1105_v12 = vpop.f32.mrb[27].mxu1 }
 0x33f   :  { %v887_v13 = vpop.f32.mrb[28].mxu0 }
 0x340   :  { %v945_v14 = vpack.c.bf16 %v887_v13, %v887_v13  ;;  %v1110_v15 = vpop.f32.mrb[29].mxu0 }
 0x341   :  { %v890_v16 = vpop.f32.mrb[30].mxu0 }
 0x342   :  { %954 = vst.msk [vmem:[#allocation8 + $0x18] sm:$0xf] %vm947_vm5, %v945_v14  ;;  %v1111_v17 = vpop.f32.mrb[31].mxu0  ;;  %v933_v18 = vpop.f32.mrb[28].mxu1 }
 0x343   :  { %v946_v19 = vpack.c.bf16 %v933_v18, %v933_v18  ;;  %v1116_v20 = vpop.f32.mrb[29].mxu1 }
 0x344   :  { %v936_v21 = vpop.f32.mrb[30].mxu1 }
 0x345   :  { %955 = vst.msk [vmem:[#allocation8 + $0x1c] sm:$0xf] %vm947_vm5, %v946_v19  ;;  %v1117_v22 = vpop.f32.mrb[31].mxu1 }
 0x346   :  { %1235 = shalt.err (!%p1232_p0)
}
 0x347   :  { %s1236_s27 = scalar_lea.hbm %s1498_s3, 512 }
 0x348   :  { %p1237_p1 = scmp.ne.s32.totalorder %s1498_s3, %s1236_s27  ;;  %p1240_p2 = scmp.lt.u32.totalorder %s1236_s27, %s1498_s3 }
 0x34a   :  { %p1242_p3 = pnand %p1240_p2, %p1237_p1 }
 0x34c   :  { %1245 = shalt.err (!%p1242_p3)
}
 0x34d   :  { %967 = dma.vmem_to_hbm [thread:$0]  %s962_s21, 512, %s1498_s3, [#allocation4], %s1254_s24, %s1254_s24, %s1255_s25  }
 0x34e   :  { %1250 = dma.done.wait [#allocation4], 512  }
 0x34f   :  { %1251 = vsyncadd [#allocation4], 4294966784 }
 0x350   :  { %971 = vsyncpa [#allocation3], 1 }
 0x351   :  { %972 = vsyncpa [#allocation6], 1 }
 0x352   :  { %973 = vsyncpa [#allocation4], 1 }

// kernel: _lambda_.13
= control target key start
LH: loop header
LB: loop body
LE: loop exit
PB: predicated region body
PF: predicated region fallthrough
CT: control target
= control target key end

     0   :  { %9 = vsyncpa [#allocation3], 0  ;;  %s536_s0 = inlined_call_operand.hbm [shape: f32[16,128], index: 0, kind: input, shape index: {}]   ;;  %s537_s1 = inlined_call_operand.hbm [shape: f32[1,128], index: 1, kind: input, shape index: {}]   ;;  %s538_s2 = inlined_call_operand.hbm [shape: f32[1,128], index: 2, kind: input, shape index: {}]   ;;  %s539_s3 = inlined_call_operand.hbm [shape: bf16[128,128], index: 3, kind: input, shape index: {}]   ;;  %s540_s4 = inlined_call_operand.hbm [shape: f32[16,128], index: 4, kind: output, shape index: {}]  }
   0x1   :  { %10 = vsyncpa [#allocation6], 0 }
   0x2   :  { %11 = vsyncpa [#allocation9], 0 }
   0x3   :  { %12 = vsyncpa [#allocation4], 0  ;;  %s420_s15 = smov [#allocation5]   ;;  %s421_s17 = smov [#allocation2]  }
   0x4   :  { %s31_s16 = sshll.u32 %s420_s15, 4  ;;  %s18_s18 = sshll.u32 %s421_s17, 4  ;;  %s32_s16 = int_to_ptr.vmem [resolvable:$true] %s31_s16  ;;  %s456_s18 = int_to_ptr.vmem [resolvable:$true] %s18_s18 }
   0x5   :  { %s302_s21 = scalar_lea.hbm %s537_s1, 16 }
   0x6   :  { %p303_p0 = scmp.ne.s32.totalorder %s537_s1, %s302_s21  ;;  %p306_p1 = scmp.lt.u32.totalorder %s302_s21, %s537_s1 }
   0x8   :  { %p308_p2 = pnand %p306_p1, %p303_p0 }
   0xa   :  { %311 = shalt.err (!%p308_p2)
}
   0xb   :  { %s312_s26 = scalar_lea.vmem %s32_s16, 16  ;;  %s316_s27 = scalar_lea.vmem %s32_s16, 32 }
   0xc   :  { %p313_p3 = scmp.ne.s32.totalorder %s32_s16, %s312_s26  ;;  %p317_p4 = scmp.lt.s32.totalorder %s32_s16, %s32_s16 }
   0xd   :  { %p318_p5 = scmp.lt.s32.totalorder %s316_s27, %s312_s26 }
   0xf   :  { %p319_p6 = por %p318_p5, %p317_p4 }
  0x11   :  { %p320_p7 = pnand %p319_p6, %p313_p3 }
  0x13   :  { %323 = shalt.err (!%p320_p7)
}
  0x14   :  { %34 = dma.hbm_to_vmem [thread:$0]  %s537_s1, 16, %s32_s16, [#allocation6]  }
  0x15   :  { %s324_s6 = scalar_lea.hbm %s536_s0, 256 }
  0x16   :  { %p325_p8 = scmp.ne.s32.totalorder %s536_s0, %s324_s6  ;;  %p328_p9 = scmp.lt.u32.totalorder %s324_s6, %s536_s0 }
  0x18   :  { %p330_p10 = pnand %p328_p9, %p325_p8 }
  0x1a   :  { %333 = shalt.err (!%p330_p10)
}
  0x1b   :  { %s334_s11 = scalar_lea.vmem %s456_s18, 256  ;;  %p339_p12 = scmp.lt.s32.totalorder %s456_s18, %s456_s18 }
  0x1c   :  { %p335_p11 = scmp.ne.s32.totalorder %s456_s18, %s334_s11  ;;  %p340_p13 = scmp.lt.s32.totalorder %s334_s11, %s334_s11 }
  0x1e   :  { %p341_p0 = por %p340_p13, %p339_p12 }
  0x20   :  { %p342_p1 = pnand %p341_p0, %p335_p11 }
  0x22   :  { %345 = shalt.err (!%p342_p1)
}
  0x23   :  { %s422_s1 = smov 128   ;;  %s423_s12 = smov 8  }
  0x24   :  { %24 = dma.hbm_to_vmem [thread:$0]  %s536_s0, 256, %s456_s18, [#allocation3], %s422_s1, %s422_s1, %s423_s12  }
  0x25   :  { %s424_s15 = smov [#allocation7]   ;;  %s425_s17 = smov [#allocation8]  }
  0x26   :  { %s41_s16 = sshll.u32 %s424_s15, 4  ;;  %s50_s19 = sshll.u32 %s425_s17, 4  ;;  %s42_s16 = int_to_ptr.vmem [resolvable:$true] %s41_s16  ;;  %s490_s19 = int_to_ptr.vmem [resolvable:$true] %s50_s19 }
  0x27   :  { %s346_s22 = scalar_lea.hbm %s538_s2, 16 }
  0x28   :  { %p347_p2 = scmp.ne.s32.totalorder %s538_s2, %s346_s22  ;;  %p350_p3 = scmp.lt.u32.totalorder %s346_s22, %s538_s2 }
  0x2a   :  { %p352_p4 = pnand %p350_p3, %p347_p2 }
  0x2c   :  { %355 = shalt.err (!%p352_p4)
}
  0x2d   :  { %s356_s0 = scalar_lea.vmem %s42_s16, 16  ;;  %s360_s18 = scalar_lea.vmem %s42_s16, 32 }
  0x2e   :  { %p357_p5 = scmp.ne.s32.totalorder %s42_s16, %s356_s0  ;;  %p361_p6 = scmp.lt.s32.totalorder %s42_s16, %s42_s16 }
  0x2f   :  { %p362_p7 = scmp.lt.s32.totalorder %s360_s18, %s356_s0 }
  0x31   :  { %p363_p8 = por %p362_p7, %p361_p6 }
  0x33   :  { %p364_p9 = pnand %p363_p8, %p357_p5 }
  0x35   :  { %367 = shalt.err (!%p364_p9)
}
  0x36   :  { %44 = dma.hbm_to_vmem [thread:$0]  %s538_s2, 16, %s42_s16, [#allocation6]  }
  0x37   :  { %s368_s5 = scalar_lea.hbm %s539_s3, 1024 }
  0x38   :  { %p369_p10 = scmp.ne.s32.totalorder %s539_s3, %s368_s5  ;;  %p372_p11 = scmp.lt.u32.totalorder %s368_s5, %s539_s3 }
  0x3a   :  { %p374_p12 = pnand %p372_p11, %p369_p10 }
  0x3c   :  { %377 = shalt.err (!%p374_p12)
}
  0x3d   :  { %s378_s10 = scalar_lea.vmem %s490_s19, 1024  ;;  %p383_p0 = scmp.lt.s32.totalorder %s490_s19, %s490_s19 }
  0x3e   :  { %p379_p13 = scmp.ne.s32.totalorder %s490_s19, %s378_s10  ;;  %p384_p1 = scmp.lt.s32.totalorder %s378_s10, %s378_s10 }
  0x40   :  { %p385_p2 = por %p384_p1, %p383_p0 }
  0x42   :  { %p386_p3 = pnand %p385_p2, %p379_p13 }
  0x44   :  { %389 = shalt.err (!%p386_p3)
}
  0x45   :  { %s426_s2 = smov 64   ;;  %s427_s11 = smov 4  }
  0x46   :  { %56 = dma.hbm_to_vmem [thread:$0]  %s539_s3, 1024, %s490_s19, [#allocation9], %s426_s2, %s426_s2, %s427_s11  }
  0x47   :  { %412 = dma.done.wait [#allocation3], 256  }
  0x48   :  { %413 = vsyncadd [#allocation3], 4294967040 }
  0x49   :  { %414 = dma.done.wait [#allocation6], 32  }
  0x4a   :  { %415 = vsyncadd [#allocation6], 4294967264 }
  0x4b   :  { %416 = dma.done.wait [#allocation9], 1024  }
  0x4c   :  { %417 = vsyncadd [#allocation9], 4294966272  ;;  %v70_v0 = vld [vmem:[#allocation2] sm:$0xff]  ;;  %v71_v1 = vld [vmem:[#allocation2 + $0x8] sm:$0xff]  ;;  %v428_v3 = vmov 0.0   ;;  %vm429_vm0 = vmmov 0  }
  0x4d   :  { %74 = vadd.xlane.f32.xlu0 %v70_v0  ;;  %v290_v2 = vld [vmem:[#allocation8] sm:$0xff]   ;;  %259 = vmatprep.subr.bf16.mxu0 %v428_v3  ;;  %v291_v12 = vld [vmem:[#allocation8 + $0x8] sm:$0xff]   ;;  %v292_v13 = vld [vmem:[#allocation8 + $0x10] sm:$0xff]   ;;  %s430_s3 = smov [#allocation10]  }
  0x4e   :  { %260 = vmatpush3.bf16.msra.mxu0 %v290_v2  ;;  %v293_v14 = vld [vmem:[#allocation8 + $0x18] sm:$0xff]   ;;  %v294_v15 = vld [vmem:[#allocation8 + $0x20] sm:$0xff]   ;;  %275 = vmatprep.mubr.msk.bf16.mxu0 %vm429_vm0, %v428_v3  ;;  %v295_v16 = vld [vmem:[#allocation8 + $0x28] sm:$0xff]   ;;  %s226_s15 = sshll.u32 %s430_s3, 4  ;;  %s227_s15 = int_to_ptr.vmem [resolvable:$true] %s226_s15 }
  0x4f   :  { %261 = vmatprep.subr.bf16.mxu0 %v428_v3  ;;  %v296_v17 = vld [vmem:[#allocation8 + $0x30] sm:$0xff]   ;;  %v297_v18 = vld [vmem:[#allocation8 + $0x38] sm:$0xff]   ;;  %s390_s16 = scalar_lea.vmem %s227_s15, 256  ;;  %p395_p5 = scmp.lt.s32.totalorder %s227_s15, %s227_s15 }
  0x50   :  { %v240_v27 = vld [vmem:[#allocation5] ss:$0 sm:$0xff]  ;;  %v241_v31 = vld [vmem:[#allocation7] ss:$0 sm:$0xff]  ;;  %p391_p4 = scmp.ne.s32.totalorder %s227_s15, %s390_s16  ;;  %p396_p6 = scmp.lt.s32.totalorder %s390_s16, %s390_s16 }
  0x51   :  { %76 = vadd.xlane.f32.xlu0 %v71_v1 }
  0x52   :  { %262 = vmatpush3.bf16.msra.mxu0 %v291_v12  ;;  %p397_p7 = por %p396_p6, %p395_p5 }
  0x53   :  { %263 = vmatprep.subr.bf16.mxu0 %v428_v3 }
  0x54   :  { %p398_p8 = pnand %p397_p7, %p391_p4 }
  0x56   :  { %264 = vmatpush3.bf16.msra.mxu0 %v292_v13 }
  0x57   :  { %265 = vmatprep.subr.bf16.mxu0 %v428_v3 }
  0x5a   :  { %266 = vmatpush3.bf16.msra.mxu0 %v293_v14 }
  0x5b   :  { %267 = vmatprep.subr.bf16.mxu0 %v428_v3 }
  0x5e   :  { %268 = vmatpush3.bf16.msra.mxu0 %v294_v15 }
  0x5f   :  { %269 = vmatprep.subr.bf16.mxu0 %v428_v3 }
  0x62   :  { %270 = vmatpush3.bf16.msra.mxu0 %v295_v16 }
  0x63   :  { %271 = vmatprep.subr.bf16.mxu0 %v428_v3 }
  0x66   :  { %272 = vmatpush3.bf16.msra.mxu0 %v296_v17 }
  0x67   :  { %273 = vmatprep.subr.bf16.mxu0 %v428_v3 }
  0x6a   :  { %274 = vmatpush3.bf16.msra.mxu0 %v297_v18 }
  0xda   :  { %v75_v4 = vpop.xlane.xlu0 %74 }
  0xdb   :  { %v79_v5 = vmul.f32 0.0078125, %v75_v4 }
  0xdd   :  { %v81_v6 = vsub.f32 %v70_v0, %v79_v5 }
  0xde   :  { %v77_v7 = vpop.xlane.xlu0 %76 }
  0xdf   :  { %v80_v8 = vmul.f32 0.0078125, %v77_v7  ;;  %v83_v9 = vmul.f32 %v81_v6, %v81_v6 }
  0xe1   :  { %v82_v10 = vsub.f32 %v71_v1, %v80_v8  ;;  %85 = vadd.xlane.f32.xlu1 %v83_v9 }
  0xe3   :  { %v84_v11 = vmul.f32 %v82_v10, %v82_v10 }
  0xe5   :  { %87 = vadd.xlane.f32.xlu1 %v84_v11 }
 0x16e   :  { %v86_v19 = vpop.xlane.xlu1 %85 }
 0x16f   :  { %v89_v20 = vmul.f32 0.0078125, %v86_v19 }
 0x171   :  { %v91_v21 = vadd.f32 1e-05, %v89_v20 }
 0x172   :  { %v88_v22 = vpop.xlane.xlu1 %87 }
 0x173   :  { %298 = vrsqrt.f32 %v91_v21  ;;  %v90_v23 = vmul.f32 0.0078125, %v88_v22 }
 0x175   :  { %v92_v24 = vadd.f32 1e-05, %v90_v23 }
 0x177   :  { %300 = vrsqrt.f32 %v92_v24 }
 0x17d   :  { %v299_v25 = vpop.eup %298 }
 0x17e   :  { %v95_v26 = vmul.f32 %v299_v25, %v81_v6 }
 0x180   :  { %v103_v30 = vmul.f32 %v240_v27, %v95_v26 }
 0x181   :  { %v301_v28 = vpop.eup %300 }
 0x182   :  { %v96_v29 = vmul.f32 %v301_v28, %v82_v10  ;;  %v111_v33 = vadd.f32 %v241_v31, %v103_v30 }
 0x184   :  { %v104_v32 = vmul.f32 %v240_v27, %v96_v29 }
 0x186   :  { %v112_v34 = vadd.f32 %v241_v31, %v104_v32 }
 0x188   :  { %v113_v35 = vpack.c.bf16 %v112_v34, %v111_v33 }
 0x18a   :  { %276 = vmatmul.mubr.bf16.vlgmr.msra.gmra.mrb[0].mxu0 %v113_v35 }
 0x25d   :  { %v212_v36 = vpop.f32.mrb[0].mxu0 }
 0x25e   :  { %219 = vst [vmem:[#allocation10] sm:$0xff] %v212_v36  ;;  %v277_v37 = vpop.f32.mrb[1].mxu0 }
 0x25f   :  { %v215_v38 = vpop.f32.mrb[2].mxu0 }
 0x260   :  { %220 = vst [vmem:[#allocation10 + $0x8] sm:$0xff] %v215_v38  ;;  %v278_v39 = vpop.f32.mrb[3].mxu0 }
 0x261   :  { %401 = shalt.err (!%p398_p8)
}
 0x262   :  { %s402_s20 = scalar_lea.hbm %s540_s4, 256 }
 0x263   :  { %p403_p9 = scmp.ne.s32.totalorder %s540_s4, %s402_s20  ;;  %p406_p10 = scmp.lt.u32.totalorder %s402_s20, %s540_s4 }
 0x265   :  { %p408_p11 = pnand %p406_p10, %p403_p9 }
 0x267   :  { %411 = shalt.err (!%p408_p11)
}
 0x268   :  { %232 = dma.vmem_to_hbm [thread:$0]  %s227_s15, 256, %s540_s4, [#allocation4], %s422_s1, %s422_s1, %s423_s12  }
 0x269   :  { %418 = dma.done.wait [#allocation4], 256  }
 0x26a   :  { %419 = vsyncadd [#allocation4], 4294967040 }
 0x26b   :  { %236 = vsyncpa [#allocation3], 1 }
 0x26c   :  { %237 = vsyncpa [#allocation6], 1 }
 0x26d   :  { %238 = vsyncpa [#allocation9], 1 }
 0x26e   :  { %239 = vsyncpa [#allocation4], 1 }

// kernel: _lambda_.9
= control target key start
LH: loop header
LB: loop body
LE: loop exit
PB: predicated region body
PF: predicated region fallthrough
CT: control target
= control target key end

     0   :  { %15 = vsyncpa [#allocation3], 0  ;;  %s1895_s0 = inlined_call_operand.hbm [shape: f32[16,128], index: 0, kind: input, shape index: {}]   ;;  %s1896_s1 = inlined_call_operand.hbm [shape: bf16[16,128], index: 1, kind: input, shape index: {}]   ;;  %s1897_s2 = inlined_call_operand.hbm [shape: bf16[128,128], index: 2, kind: input, shape index: {}]   ;;  %s1898_s3 = inlined_call_operand.hbm [shape: f32[1,128], index: 3, kind: input, shape index: {}]   ;;  %s1899_s4 = inlined_call_operand.hbm [shape: f32[1,128], index: 4, kind: input, shape index: {}]   ;;  %s1900_s5 = inlined_call_operand.hbm [shape: f32[1,128], index: 5, kind: input, shape index: {}]   ;;  %s1901_s6 = inlined_call_operand.hbm [shape: bf16[128,512], index: 6, kind: input, shape index: {}]   ;;  %s1902_s7 = inlined_call_operand.hbm [shape: f32[1,512], index: 7, kind: input, shape index: {}]   ;;  %s1903_s8 = inlined_call_operand.hbm [shape: bf16[512,128], index: 8, kind: input, shape index: {}]   ;;  %s1904_s9 = inlined_call_operand.hbm [shape: f32[1,128], index: 9, kind: input, shape index: {}]   ;;  %s1905_s10 = inlined_call_operand.hbm [shape: f32[16,128], index: 10, kind: output, shape index: {}]  }
   0x1   :  { %16 = vsyncpa [#allocation6], 0 }
   0x2   :  { %17 = vsyncpa [#allocation9], 0 }
   0x3   :  { %18 = vsyncpa [#allocation12], 0 }
   0x4   :  { %19 = vsyncpa [#allocation15], 0 }
   0x5   :  { %20 = vsyncpa [#allocation18], 0 }
   0x6   :  { %21 = vsyncpa [#allocation4], 0  ;;  %s1611_s13 = smov [#allocation5]   ;;  %s1355_s17 = scalar_lea.hbm %s1896_s1, 128 }
   0x7   :  { %s39_s14 = sshll.u32 %s1611_s13, 4  ;;  %p1356_p0 = scmp.ne.s32.totalorder %s1896_s1, %s1355_s17  ;;  %s40_s14 = int_to_ptr.vmem [resolvable:$true] %s39_s14 }
   0x8   :  { %p1359_p1 = scmp.lt.u32.totalorder %s1355_s17, %s1896_s1 }
   0xa   :  { %p1361_p2 = pnand %p1359_p1, %p1356_p0 }
   0xc   :  { %1364 = shalt.err (!%p1361_p2)
}
   0xd   :  { %s1365_s22 = scalar_lea.vmem %s40_s14, 128  ;;  %p1370_p4 = scmp.lt.s32.totalorder %s40_s14, %s40_s14 }
   0xe   :  { %p1366_p3 = scmp.ne.s32.totalorder %s40_s14, %s1365_s22  ;;  %p1371_p5 = scmp.lt.s32.totalorder %s1365_s22, %s1365_s22 }
  0x10   :  { %p1372_p6 = por %p1371_p5, %p1370_p4 }
  0x12   :  { %p1373_p7 = pnand %p1372_p6, %p1366_p3 }
  0x14   :  { %1376 = shalt.err (!%p1373_p7)
}
  0x15   :  { %s1612_s23 = smov 64   ;;  %s1613_s24 = smov 4  }
  0x16   :  { %45 = dma.hbm_to_vmem [thread:$0]  %s1896_s1, 128, %s40_s14, [#allocation6], %s1612_s23, %s1612_s23, %s1613_s24  }
  0x17   :  { %s1614_s27 = smov [#allocation8]   ;;  %s1615_s29 = smov [#allocation11]  }
  0x18   :  { %s64_s28 = sshll.u32 %s1614_s27, 4  ;;  %s84_s30 = sshll.u32 %s1615_s29, 4  ;;  %s65_s28 = int_to_ptr.vmem [resolvable:$true] %s64_s28  ;;  %s85_s30 = int_to_ptr.vmem [resolvable:$true] %s84_s30 }
  0x19   :  { %s1377_s13 = scalar_lea.hbm %s1898_s3, 16 }
  0x1a   :  { %p1378_p8 = scmp.ne.s32.totalorder %s1898_s3, %s1377_s13  ;;  %p1381_p9 = scmp.lt.u32.totalorder %s1377_s13, %s1898_s3 }
  0x1c   :  { %p1383_p10 = pnand %p1381_p9, %p1378_p8 }
  0x1e   :  { %1386 = shalt.err (!%p1383_p10)
}
  0x1f   :  { %s1387_s1 = scalar_lea.vmem %s65_s28, 16  ;;  %s1391_s14 = scalar_lea.vmem %s65_s28, 32 }
  0x20   :  { %p1388_p11 = scmp.ne.s32.totalorder %s65_s28, %s1387_s1  ;;  %p1392_p12 = scmp.lt.s32.totalorder %s65_s28, %s65_s28 }
  0x21   :  { %p1393_p13 = scmp.lt.s32.totalorder %s1391_s14, %s1387_s1 }
  0x23   :  { %p1394_p0 = por %p1393_p13, %p1392_p12 }
  0x25   :  { %p1395_p1 = pnand %p1394_p0, %p1388_p11 }
  0x27   :  { %1398 = shalt.err (!%p1395_p1)
}
  0x28   :  { %67 = dma.hbm_to_vmem [thread:$0]  %s1898_s3, 16, %s65_s28, [#allocation9]  }
  0x29   :  { %s1399_s25 = scalar_lea.hbm %s1900_s5, 16 }
  0x2a   :  { %p1400_p2 = scmp.ne.s32.totalorder %s1900_s5, %s1399_s25  ;;  %p1403_p3 = scmp.lt.u32.totalorder %s1399_s25, %s1900_s5 }
  0x2c   :  { %p1405_p4 = pnand %p1403_p3, %p1400_p2 }
  0x2e   :  { %1408 = shalt.err (!%p1405_p4)
}
  0x2f   :  { %s1409_s12 = scalar_lea.vmem %s85_s30, 16  ;;  %s1413_s13 = scalar_lea.vmem %s85_s30, 32 }
  0x30   :  { %p1410_p5 = scmp.ne.s32.totalorder %s85_s30, %s1409_s12  ;;  %p1414_p6 = scmp.lt.s32.totalorder %s85_s30, %s85_s30 }
  0x31   :  { %p1415_p7 = scmp.lt.s32.totalorder %s1413_s13, %s1409_s12 }
  0x33   :  { %p1416_p8 = por %p1415_p7, %p1414_p6 }
  0x35   :  { %p1417_p9 = pnand %p1416_p8, %p1410_p5 }
  0x37   :  { %1420 = shalt.err (!%p1417_p9)
}
  0x38   :  { %87 = dma.hbm_to_vmem [thread:$0]  %s1900_s5, 16, %s85_s30, [#allocation12]  }
  0x39   :  { %s1616_s15 = smov [#allocation14]   ;;  %s1617_s17 = smov [#allocation2]  }
  0x3a   :  { %s106_s16 = sshll.u32 %s1616_s15, 4  ;;  %s27_s18 = sshll.u32 %s1617_s17, 4  ;;  %s107_s16 = int_to_ptr.vmem [resolvable:$true] %s106_s16  ;;  %s28_s18 = int_to_ptr.vmem [resolvable:$true] %s27_s18 }
  0x3b   :  { %s1421_s19 = scalar_lea.hbm %s1902_s7, 64 }
  0x3c   :  { %p1422_p10 = scmp.ne.s32.totalorder %s1902_s7, %s1421_s19  ;;  %p1425_p11 = scmp.lt.u32.totalorder %s1421_s19, %s1902_s7 }
  0x3e   :  { %p1427_p12 = pnand %p1425_p11, %p1422_p10 }
  0x40   :  { %1430 = shalt.err (!%p1427_p12)
}
  0x41   :  { %s1431_s5 = scalar_lea.vmem %s107_s16, 64  ;;  %p1436_p0 = scmp.lt.s32.totalorder %s107_s16, %s107_s16 }
  0x42   :  { %p1432_p13 = scmp.ne.s32.totalorder %s107_s16, %s1431_s5  ;;  %p1437_p1 = scmp.lt.s32.totalorder %s1431_s5, %s1431_s5 }
  0x44   :  { %p1438_p2 = por %p1437_p1, %p1436_p0 }
  0x46   :  { %p1439_p3 = pnand %p1438_p2, %p1432_p13 }
  0x48   :  { %1442 = shalt.err (!%p1439_p3)
}
  0x49   :  { %109 = dma.hbm_to_vmem [thread:$0]  %s1902_s7, 64, %s107_s16, [#allocation15]  }
  0x4a   :  { %s1443_s11 = scalar_lea.hbm %s1895_s0, 256 }
  0x4b   :  { %p1444_p4 = scmp.ne.s32.totalorder %s1895_s0, %s1443_s11  ;;  %p1447_p5 = scmp.lt.u32.totalorder %s1443_s11, %s1895_s0 }
  0x4d   :  { %p1449_p6 = pnand %p1447_p5, %p1444_p4 }
  0x4f   :  { %1452 = shalt.err (!%p1449_p6)
}
  0x50   :  { %s1453_s15 = scalar_lea.vmem %s28_s18, 256  ;;  %p1458_p8 = scmp.lt.s32.totalorder %s28_s18, %s28_s18 }
  0x51   :  { %p1454_p7 = scmp.ne.s32.totalorder %s28_s18, %s1453_s15  ;;  %p1459_p9 = scmp.lt.s32.totalorder %s1453_s15, %s1453_s15 }
  0x53   :  { %p1460_p10 = por %p1459_p9, %p1458_p8 }
  0x55   :  { %p1461_p11 = pnand %p1460_p10, %p1454_p7 }
  0x57   :  { %1464 = shalt.err (!%p1461_p11)
}
  0x58   :  { %s1618_s7 = smov 128   ;;  %s1619_s16 = smov 8  }
  0x59   :  { %33 = dma.hbm_to_vmem [thread:$0]  %s1895_s0, 256, %s28_s18, [#allocation3], %s1618_s7, %s1618_s7, %s1619_s16  }
  0x5a   :  { %s1620_s14 = smov [#allocation7]   ;;  %s1621_s20 = smov [#allocation10]  }
  0x5b   :  { %s51_s19 = sshll.u32 %s1620_s14, 4  ;;  %s74_s21 = sshll.u32 %s1621_s20, 4  ;;  %s52_s19 = int_to_ptr.vmem [resolvable:$true] %s51_s19  ;;  %s75_s21 = int_to_ptr.vmem [resolvable:$true] %s74_s21 }
  0x5c   :  { %s1465_s5 = scalar_lea.hbm %s1897_s2, 1024 }
  0x5d   :  { %p1466_p12 = scmp.ne.s32.totalorder %s1897_s2, %s1465_s5  ;;  %p1469_p13 = scmp.lt.u32.totalorder %s1465_s5, %s1897_s2 }
  0x5f   :  { %p1471_p0 = pnand %p1469_p13, %p1466_p12 }
  0x61   :  { %1474 = shalt.err (!%p1471_p0)
}
  0x62   :  { %s1475_s0 = scalar_lea.vmem %s52_s19, 1024  ;;  %p1480_p2 = scmp.lt.s32.totalorder %s52_s19, %s52_s19 }
  0x63   :  { %p1476_p1 = scmp.ne.s32.totalorder %s52_s19, %s1475_s0  ;;  %p1481_p3 = scmp.lt.s32.totalorder %s1475_s0, %s1475_s0 }
  0x65   :  { %p1482_p4 = por %p1481_p3, %p1480_p2 }
  0x67   :  { %p1483_p5 = pnand %p1482_p4, %p1476_p1 }
  0x69   :  { %1486 = shalt.err (!%p1483_p5)
}
  0x6a   :  { %57 = dma.hbm_to_vmem [thread:$0]  %s1897_s2, 1024, %s52_s19, [#allocation6], %s1612_s23, %s1612_s23, %s1613_s24  }
  0x6b   :  { %s1487_s3 = scalar_lea.hbm %s1899_s4, 16 }
  0x6c   :  { %p1488_p6 = scmp.ne.s32.totalorder %s1899_s4, %s1487_s3  ;;  %p1491_p7 = scmp.lt.u32.totalorder %s1487_s3, %s1899_s4 }
  0x6e   :  { %p1493_p8 = pnand %p1491_p7, %p1488_p6 }
  0x70   :  { %1496 = shalt.err (!%p1493_p8)
}
  0x71   :  { %s1497_s14 = scalar_lea.vmem %s75_s21, 16  ;;  %s1501_s20 = scalar_lea.vmem %s75_s21, 32 }
  0x72   :  { %p1498_p9 = scmp.ne.s32.totalorder %s75_s21, %s1497_s14  ;;  %p1502_p10 = scmp.lt.s32.totalorder %s75_s21, %s75_s21 }
  0x73   :  { %p1503_p11 = scmp.lt.s32.totalorder %s1501_s20, %s1497_s14 }
  0x75   :  { %p1504_p12 = por %p1503_p11, %p1502_p10 }
  0x77   :  { %p1505_p13 = pnand %p1504_p12, %p1498_p9 }
  0x79   :  { %1508 = shalt.err (!%p1505_p13)
}
  0x7a   :  { %77 = dma.hbm_to_vmem [thread:$0]  %s1899_s4, 16, %s75_s21, [#allocation9]  }
  0x7b   :  { %s1622_s22 = smov [#allocation13]   ;;  %s1509_s26 = scalar_lea.hbm %s1901_s6, 4096 }
  0x7c   :  { %s93_s25 = sshll.u32 %s1622_s22, 4  ;;  %p1510_p0 = scmp.ne.s32.totalorder %s1901_s6, %s1509_s26  ;;  %s94_s25 = int_to_ptr.vmem [resolvable:$true] %s93_s25 }
  0x7d   :  { %p1513_p1 = scmp.lt.u32.totalorder %s1509_s26, %s1901_s6 }
  0x7f   :  { %p1515_p2 = pnand %p1513_p1, %p1510_p0 }
  0x81   :  { %1518 = shalt.err (!%p1515_p2)
}
  0x82   :  { %s1519_s11 = scalar_lea.vmem %s94_s25, 4096  ;;  %p1524_p4 = scmp.lt.s32.totalorder %s94_s25, %s94_s25 }
  0x83   :  { %p1520_p3 = scmp.ne.s32.totalorder %s94_s25, %s1519_s11  ;;  %p1525_p5 = scmp.lt.s32.totalorder %s1519_s11, %s1519_s11 }
  0x85   :  { %p1526_p6 = por %p1525_p5, %p1524_p4 }
  0x87   :  { %p1527_p7 = pnand %p1526_p6, %p1520_p3 }
  0x89   :  { %1530 = shalt.err (!%p1527_p7)
}
  0x8a   :  { %s1623_s4 = smov 256   ;;  %s1624_s21 = smov 16  }
  0x8b   :  { %99 = dma.hbm_to_vmem [thread:$0]  %s1901_s6, 4096, %s94_s25, [#allocation12], %s1623_s4, %s1623_s4, %s1624_s21  }
  0x8c   :  { %s1625_s3 = smov [#allocation16]   ;;  %s1626_s15 = smov [#allocation17]  }
  0x8d   :  { %s115_s28 = sshll.u32 %s1625_s3, 4  ;;  %s128_s17 = sshll.u32 %s1626_s15, 4  ;;  %s116_s28 = int_to_ptr.vmem [resolvable:$true] %s115_s28  ;;  %s129_s17 = int_to_ptr.vmem [resolvable:$true] %s128_s17 }
  0x8e   :  { %s1531_s20 = scalar_lea.hbm %s1903_s8, 4096 }
  0x8f   :  { %p1532_p8 = scmp.ne.s32.totalorder %s1903_s8, %s1531_s20  ;;  %p1535_p9 = scmp.lt.u32.totalorder %s1531_s20, %s1903_s8 }
  0x91   :  { %p1537_p10 = pnand %p1535_p9, %p1532_p8 }
  0x93   :  { %1540 = shalt.err (!%p1537_p10)
}
  0x94   :  { %s1541_s6 = scalar_lea.vmem %s116_s28, 4096  ;;  %p1546_p12 = scmp.lt.s32.totalorder %s116_s28, %s116_s28 }
  0x95   :  { %p1542_p11 = scmp.ne.s32.totalorder %s116_s28, %s1541_s6  ;;  %p1547_p13 = scmp.lt.s32.totalorder %s1541_s6, %s1541_s6 }
  0x97   :  { %p1548_p0 = por %p1547_p13, %p1546_p12 }
  0x99   :  { %p1549_p1 = pnand %p1548_p0, %p1542_p11 }
  0x9b   :  { %1552 = shalt.err (!%p1549_p1)
}
  0x9c   :  { %121 = dma.hbm_to_vmem [thread:$0]  %s1903_s8, 4096, %s116_s28, [#allocation15], %s1612_s23, %s1612_s23, %s1613_s24  }
  0x9d   :  { %s1553_s29 = scalar_lea.hbm %s1904_s9, 16 }
  0x9e   :  { %p1554_p2 = scmp.ne.s32.totalorder %s1904_s9, %s1553_s29  ;;  %p1557_p3 = scmp.lt.u32.totalorder %s1553_s29, %s1904_s9 }
  0xa0   :  { %p1559_p4 = pnand %p1557_p3, %p1554_p2 }
  0xa2   :  { %1562 = shalt.err (!%p1559_p4)
}
  0xa3   :  { %s1563_s21 = scalar_lea.vmem %s129_s17, 16  ;;  %s1567_s12 = scalar_lea.vmem %s129_s17, 32 }
  0xa4   :  { %p1564_p5 = scmp.ne.s32.totalorder %s129_s17, %s1563_s21  ;;  %p1568_p6 = scmp.lt.s32.totalorder %s129_s17, %s129_s17 }
  0xa5   :  { %p1569_p7 = scmp.lt.s32.totalorder %s1567_s12, %s1563_s21 }
  0xa7   :  { %p1570_p8 = por %p1569_p7, %p1568_p6 }
  0xa9   :  { %p1571_p9 = pnand %p1570_p8, %p1564_p5 }
  0xab   :  { %1574 = shalt.err (!%p1571_p9)
}
  0xac   :  { %131 = dma.hbm_to_vmem [thread:$0]  %s1904_s9, 16, %s129_s17, [#allocation18]  }
  0xad   :  { %1597 = dma.done.wait [#allocation3], 256  }
  0xae   :  { %1598 = vsyncadd [#allocation3], 4294967040 }
  0xaf   :  { %1599 = dma.done.wait [#allocation6], 1152  }
  0xb0   :  { %1600 = vsyncadd [#allocation6], 4294966144 }
  0xb1   :  { %1601 = dma.done.wait [#allocation9], 32  }
  0xb2   :  { %1602 = vsyncadd [#allocation9], 4294967264 }
  0xb3   :  { %1603 = dma.done.wait [#allocation12], 4112  }
  0xb4   :  { %1604 = vsyncadd [#allocation12], 4294963184 }
  0xb5   :  { %1605 = dma.done.wait [#allocation15], 4160  }
  0xb6   :  { %1606 = vsyncadd [#allocation15], 4294963136 }
  0xb7   :  { %1607 = dma.done.wait [#allocation18], 16  }
  0xb8   :  { %1608 = vsyncadd [#allocation18], 4294967280  ;;  %v1627_v0 = vmov 0.0   ;;  %vm1628_vm0 = vmmov 0   ;;  %v1246_v1 = vld [vmem:[#allocation7] sm:$0xff]   ;;  %v1247_v2 = vld [vmem:[#allocation7 + $0x8] sm:$0xff]  }
  0xb9   :  { %1206 = vmatprep.subr.bf16.mxu0 %v1627_v0  ;;  %1222 = vmatprep.mubr.msk.bf16.mxu0 %vm1628_vm0, %v1627_v0  ;;  %v1248_v3 = vld [vmem:[#allocation7 + $0x10] sm:$0xff]   ;;  %v1249_v4 = vld [vmem:[#allocation7 + $0x18] sm:$0xff]   ;;  %v1250_v5 = vld [vmem:[#allocation7 + $0x20] sm:$0xff]   ;;  %v1629_v55 = vmov 0   ;;  %s1630_s9 = smov [#allocation19]  }
  0xba   :  { %1207 = vmatpush3.bf16.msra.mxu0 %v1246_v1  ;;  %v1251_v6 = vld [vmem:[#allocation7 + $0x28] sm:$0xff]   ;;  %v1252_v7 = vld [vmem:[#allocation7 + $0x30] sm:$0xff]   ;;  %v1253_v8 = vld [vmem:[#allocation7 + $0x38] sm:$0xff]   ;;  %575 = vmatprep.mubr.bf16.mxu1 %v1629_v55  ;;  %s1059_s24 = sshll.u32 %s1630_s9, 4  ;;  %s1060_s24 = int_to_ptr.vmem [resolvable:$true] %s1059_s24 }
  0xbb   :  { %1208 = vmatprep.subr.bf16.mxu0 %v1627_v0  ;;  %v1254_v9 = vld [vmem:[#allocation5] sm:$0xff]   ;;  %v1076_v10 = vld [vmem:[#allocation8] ss:$0 sm:$0xff]  ;;  %v163_v11 = vld [vmem:[#allocation2] sm:$0xff]  ;;  %s1575_s13 = scalar_lea.vmem %s1060_s24, 256  ;;  %p1580_p11 = scmp.lt.s32.totalorder %s1060_s24, %s1060_s24 }
  0xbc   :  { %v164_v19 = vld [vmem:[#allocation2 + $0x8] sm:$0xff]  ;;  %v1255_v21 = vld [vmem:[#allocation13 + $0x4] ss:$16 sps:$4 sm:$0xff]   ;;  %p1576_p10 = scmp.ne.s32.totalorder %s1060_s24, %s1575_s13  ;;  %p1581_p12 = scmp.lt.s32.totalorder %s1575_s13, %s1575_s13 }
  0xbd   :  { %v1257_v22 = vld [vmem:[#allocation13 + $0x8] ss:$16 sps:$4 sm:$0xff]   ;;  %v1259_v23 = vld [vmem:[#allocation13 + $0xc] ss:$16 sps:$4 sm:$0xff]   ;;  %v1260_v24 = vld [vmem:[#allocation13] ss:$16 sps:$4 sm:$0xff]   ;;  %543 = vmatprep.subr.bf16.mxu1 %v1255_v21 }
  0xbe   :  { %1209 = vmatpush3.bf16.msra.mxu0 %v1247_v2  ;;  %v1261_v25 = vld [vmem:[#allocation13 + $0x24] ss:$16 sps:$4 sm:$0xff]   ;;  %v1265_v26 = vld [vmem:[#allocation13 + $0x2c] ss:$16 sps:$4 sm:$0xff]   ;;  %544 = vmatpush1.bf16.msra.mxu1 %v1260_v24  ;;  %v1263_v27 = vld [vmem:[#allocation13 + $0x28] ss:$16 sps:$4 sm:$0xff]   ;;  %p1582_p13 = por %p1581_p12, %p1580_p11 }
  0xbf   :  { %1210 = vmatprep.subr.bf16.mxu0 %v1627_v0  ;;  %545 = vmatprep.subr.bf16.mxu1 %v1261_v25  ;;  %v1266_v36 = vld [vmem:[#allocation13 + $0x20] ss:$16 sps:$4 sm:$0xff]   ;;  %v1267_v37 = vld [vmem:[#allocation13 + $0x44] ss:$16 sps:$4 sm:$0xff]   ;;  %v1271_v38 = vld [vmem:[#allocation13 + $0x4c] ss:$16 sps:$4 sm:$0xff]  }
  0xc0   :  { %v1269_v39 = vld [vmem:[#allocation13 + $0x48] ss:$16 sps:$4 sm:$0xff]   ;;  %v1272_v40 = vld [vmem:[#allocation13 + $0x40] ss:$16 sps:$4 sm:$0xff]   ;;  %v1273_v41 = vld [vmem:[#allocation13 + $0x64] ss:$16 sps:$4 sm:$0xff]   ;;  %p1583_p0 = pnand %p1582_p13, %p1576_p10 }
  0xc1   :  { %v1277_v42 = vld [vmem:[#allocation13 + $0x6c] ss:$16 sps:$4 sm:$0xff]   ;;  %v1275_v43 = vld [vmem:[#allocation13 + $0x68] ss:$16 sps:$4 sm:$0xff]   ;;  %v1278_v44 = vld [vmem:[#allocation13 + $0x60] ss:$16 sps:$4 sm:$0xff]  }
  0xc2   :  { %1211 = vmatpush3.bf16.msra.mxu0 %v1248_v3  ;;  %546 = vmatpush1.bf16.msra.mxu1 %v1266_v36  ;;  %v1279_v45 = vld [vmem:[#allocation13 + $0x84] ss:$16 sps:$4 sm:$0xff]   ;;  %v1281_v46 = vld [vmem:[#allocation13 + $0x88] ss:$16 sps:$4 sm:$0xff]   ;;  %v1283_v47 = vld [vmem:[#allocation13 + $0x8c] ss:$16 sps:$4 sm:$0xff]  }
  0xc3   :  { %1212 = vmatprep.subr.bf16.mxu0 %v1627_v0  ;;  %547 = vmatprep.subr.bf16.mxu1 %v1267_v37  ;;  %v1284_v48 = vld [vmem:[#allocation13 + $0x80] ss:$16 sps:$4 sm:$0xff]   ;;  %v1285_v49 = vld [vmem:[#allocation13 + $0xa4] ss:$16 sps:$4 sm:$0xff]   ;;  %v1289_v50 = vld [vmem:[#allocation13 + $0xac] ss:$16 sps:$4 sm:$0xff]  }
  0xc4   :  { %v1287_v51 = vld [vmem:[#allocation13 + $0xa8] ss:$16 sps:$4 sm:$0xff]   ;;  %v1290_v52 = vld [vmem:[#allocation13 + $0xa0] ss:$16 sps:$4 sm:$0xff]   ;;  %v1291_v53 = vld [vmem:[#allocation13 + $0xc4] ss:$16 sps:$4 sm:$0xff]  }
  0xc5   :  { %v1295_v54 = vld [vmem:[#allocation13 + $0xcc] ss:$16 sps:$4 sm:$0xff]   ;;  %v1293_v56 = vld [vmem:[#allocation13 + $0xc8] ss:$16 sps:$4 sm:$0xff]   ;;  %v1296_v57 = vld [vmem:[#allocation13 + $0xc0] ss:$16 sps:$4 sm:$0xff]  }
  0xc6   :  { %1213 = vmatpush3.bf16.msra.mxu0 %v1249_v4  ;;  %548 = vmatpush1.bf16.msra.mxu1 %v1272_v40  ;;  %v1297_v58 = vld [vmem:[#allocation13 + $0xe4] ss:$16 sps:$4 sm:$0xff]   ;;  %v1301_v59 = vld [vmem:[#allocation13 + $0xec] ss:$16 sps:$4 sm:$0xff]   ;;  %v1299_v60 = vld [vmem:[#allocation13 + $0xe8] ss:$16 sps:$4 sm:$0xff]  }
  0xc7   :  { %1214 = vmatprep.subr.bf16.mxu0 %v1627_v0  ;;  %549 = vmatprep.subr.bf16.mxu1 %v1273_v41  ;;  %v1302_v61 = vld [vmem:[#allocation13 + $0xe0] ss:$16 sps:$4 sm:$0xff]   ;;  %v1311_v25 = vld [vmem:[#allocation16 + $0x50] sm:$0xff]   ;;  %v1322_v36 = vld [vmem:[#allocation16 + $0xa0] sm:$0xff]  }
  0xc8   :  { %v1307_v21 = vld [vmem:[#allocation16 + $0x48] sm:$0xff]   ;;  %v1327_v41 = vld [vmem:[#allocation16 + $0x70] sm:$0xff]  }
  0xc9   :  { %v1310_v24 = vld [vmem:[#allocation16 + $0x88] sm:$0xff]  }
  0xca   :  { %1215 = vmatpush3.bf16.msra.mxu0 %v1250_v5  ;;  %550 = vmatpush1.bf16.msra.mxu1 %v1278_v44  ;;  %v1323_v37 = vld [vmem:[#allocation16 + $0x68] sm:$0xff]   ;;  %v1330_v44 = vld [vmem:[#allocation16 + $0xb0] sm:$0xff]  }
  0xcb   :  { %1216 = vmatprep.subr.bf16.mxu0 %v1627_v0  ;;  %551 = vmatprep.subr.bf16.mxu1 %v1279_v45  ;;  %v1326_v40 = vld [vmem:[#allocation16 + $0xa8] sm:$0xff]   ;;  %v1331_v45 = vld [vmem:[#allocation16 + $0x78] sm:$0xff]  }
  0xce   :  { %1217 = vmatpush3.bf16.msra.mxu0 %v1251_v6  ;;  %552 = vmatpush1.bf16.msra.mxu1 %v1284_v48  ;;  %v1086_v6 = vld [vmem:[#allocation10] ss:$0 sm:$0xff] }
  0xcf   :  { %1218 = vmatprep.subr.bf16.mxu0 %v1627_v0  ;;  %553 = vmatprep.subr.bf16.mxu1 %v1285_v49  ;;  %v1334_v48 = vld [vmem:[#allocation16 + $0xb8] sm:$0xff]   ;;  %v363_v49 = vlaneseq }
  0xd2   :  { %1219 = vmatpush3.bf16.msra.mxu0 %v1252_v7  ;;  %554 = vmatpush1.bf16.msra.mxu1 %v1290_v52 }
  0xd3   :  { %1220 = vmatprep.subr.bf16.mxu0 %v1627_v0  ;;  %555 = vmatprep.subr.bf16.mxu1 %v1291_v53  ;;  %v361_v53 = vld [vmem:[#allocation14] sm:$0xf] }
  0xd6   :  { %1221 = vmatpush3.bf16.msra.mxu0 %v1253_v8  ;;  %556 = vmatpush1.bf16.msra.mxu1 %v1296_v57 }
  0xd7   :  { %586 = vmatprep.subr.bf16.mxu0 %v1259_v23  ;;  %557 = vmatprep.subr.bf16.mxu1 %v1297_v58  ;;  %v1309_v23 = vld [vmem:[#allocation16 + $0x8] sm:$0xff]  }
  0xd9   :  { %1223 = vmatmul.mubr.bf16.vlgmr.msra.gmra.mrb[0].mxu0 %v1254_v9 }
  0xda   :  { %587 = vmatpush1.bf16.msra.mxu0 %v1257_v22  ;;  %618 = vmatprep.mubr.bf16.mxu0 %v1629_v55  ;;  %v1308_v22 = vld [vmem:[#allocation16 + $0xc8] sm:$0xff]  }
  0xdb   :  { %588 = vmatprep.subr.bf16.mxu0 %v1265_v26  ;;  %558 = vmatpush1.bf16.msra.mxu1 %v1302_v61  ;;  %v1312_v26 = vld [vmem:[#allocation16 + $0xd0] sm:$0xff]  }
  0xde   :  { %589 = vmatpush1.bf16.msra.mxu0 %v1263_v27  ;;  %v1313_v27 = vld [vmem:[#allocation16 + $0x10] sm:$0xff]  }
  0xdf   :  { %590 = vmatprep.subr.bf16.mxu0 %v1271_v38  ;;  %v1324_v38 = vld [vmem:[#allocation16 + $0xe8] sm:$0xff]  }
  0xe2   :  { %591 = vmatpush1.bf16.msra.mxu0 %v1269_v39  ;;  %v1325_v39 = vld [vmem:[#allocation16 + $0x28] sm:$0xff]  }
  0xe3   :  { %592 = vmatprep.subr.bf16.mxu0 %v1277_v42  ;;  %v1328_v42 = vld [vmem:[#allocation16 + $0xf0] sm:$0xff]  }
  0xe6   :  { %593 = vmatpush1.bf16.msra.mxu0 %v1275_v43  ;;  %v1329_v43 = vld [vmem:[#allocation16 + $0x30] sm:$0xff]  }
  0xe7   :  { %594 = vmatprep.subr.bf16.mxu0 %v1283_v47  ;;  %v1333_v47 = vld [vmem:[#allocation16 + $0x38] sm:$0xff]  }
  0xea   :  { %595 = vmatpush1.bf16.msra.mxu0 %v1281_v46  ;;  %v1332_v46 = vld [vmem:[#allocation16 + $0xf8] sm:$0xff]  }
  0xeb   :  { %596 = vmatprep.subr.bf16.mxu0 %v1289_v50  ;;  %v364_v50 = vshrl.u32 %v363_v49, 7 }
  0xed   :  { %v373_v52 = vsub.s32 2, %v364_v50  ;;  %v377_v55 = vsub.s32 3, %v364_v50 }
  0xee   :  { %597 = vmatpush1.bf16.msra.mxu0 %v1287_v51  ;;  %v365_v51 = vsub.s32 0, %v364_v50 }
  0xef   :  { %598 = vmatprep.subr.bf16.mxu0 %v1295_v54  ;;  %v369_v54 = vsub.s32 1, %v364_v50  ;;  %v374_v57 = vrot.slane %v361_v53, %v373_v52 }
  0xf1   :  { %v370_v58 = vrot.slane %v361_v53, %v369_v54 }
  0xf2   :  { %599 = vmatpush1.bf16.msra.mxu0 %v1293_v56  ;;  %v366_v56 = vrot.slane %v361_v53, %v365_v51 }
  0xf3   :  { %600 = vmatprep.subr.bf16.mxu0 %v1301_v59  ;;  %v378_v59 = vrot.slane %v361_v53, %v377_v55 }
  0xf6   :  { %601 = vmatpush1.bf16.msra.mxu0 %v1299_v60 }
 0x1ac   :  { %v278_v12 = vpop.f32.mrb[0].mxu0 }
 0x1ad   :  { %v279_v13 = vadd.f32 %v1076_v10, %v278_v12  ;;  %v1224_v14 = vpop.f32.mrb[1].mxu0 }
 0x1ae   :  { %v281_v15 = vpop.f32.mrb[2].mxu0 }
 0x1af   :  { %v1818_v16 = vadd.f32 %v279_v13, %v163_v11  ;;  %v282_v17 = vadd.f32 %v1076_v10, %v281_v15  ;;  %v1225_v18 = vpop.f32.mrb[3].mxu0  ;;  %v1087_v10 = vld [vmem:[#allocation11] ss:$0 sm:$0xff]  ;;  %v1303_v15 = vld [vmem:[#allocation16 + $0x40] sm:$0xff]  }
 0x1b0   :  { %v1305_v18 = vld [vmem:[#allocation16] sm:$0xff]   ;;  %1162 = vmatprep.subr.bf16.mxu1 %v1303_v15 }
 0x1b1   :  { %289 = vadd.xlane.f32.xlu0 %v1818_v16  ;;  %v1821_v20 = vadd.f32 %v282_v17, %v164_v19  ;;  %v1304_v17 = vld [vmem:[#allocation16 + $0xc0] sm:$0xff]  }
 0x1b2   :  { %v1306_v19 = vld [vmem:[#allocation16 + $0x80] sm:$0xff]   ;;  %1184 = vmatprep.subr.bf16.mxu0 %v1304_v17 }
 0x1b5   :  { %291 = vadd.xlane.f32.xlu0 %v1821_v20 }
 0x23e   :  { %v290_v28 = vpop.xlane.xlu0 %289 }
 0x23f   :  { %v294_v29 = vmul.f32 0.0078125, %v290_v28  ;;  %v1314_v28 = vld [vmem:[#allocation16 + $0x90] sm:$0xff]  }
 0x241   :  { %v1825_v30 = vsub.f32 %v1818_v16, %v294_v29  ;;  %v1315_v29 = vld [vmem:[#allocation16 + $0x58] sm:$0xff]  }
 0x242   :  { %v292_v31 = vpop.xlane.xlu0 %291 }
 0x243   :  { %v295_v32 = vmul.f32 0.0078125, %v292_v31  ;;  %v298_v33 = vmul.f32 %v1825_v30, %v1825_v30  ;;  %v1317_v31 = vld [vmem:[#allocation16 + $0x18] sm:$0xff]  }
 0x245   :  { %v1830_v34 = vsub.f32 %v1821_v20, %v295_v32  ;;  %300 = vadd.xlane.f32.xlu1 %v298_v33  ;;  %v1318_v32 = vld [vmem:[#allocation16 + $0x98] sm:$0xff]   ;;  %v1319_v33 = vld [vmem:[#allocation16 + $0x60] sm:$0xff]  }
 0x247   :  { %v299_v35 = vmul.f32 %v1830_v34, %v1830_v34 }
 0x249   :  { %302 = vadd.xlane.f32.xlu1 %v299_v35  ;;  %v1321_v35 = vld [vmem:[#allocation16 + $0x20] sm:$0xff]  }
 0x2d2   :  { %v301_v62 = vpop.xlane.xlu1 %300 }
 0x2d3   :  { %v304_v63 = vmul.f32 0.0078125, %v301_v62 }
 0x2d5   :  { %v306_v0 = vadd.f32 1e-05, %v304_v63 }
 0x2d6   :  { %v303_v1 = vpop.xlane.xlu1 %302 }
 0x2d7   :  { %1335 = vrsqrt.f32 %v306_v0  ;;  %v305_v2 = vmul.f32 0.0078125, %v303_v1 }
 0x2d9   :  { %v307_v3 = vadd.f32 1e-05, %v305_v2 }
 0x2db   :  { %1337 = vrsqrt.f32 %v307_v3 }
 0x2e1   :  { %v1336_v4 = vpop.eup %1335 }
 0x2e2   :  { %v310_v5 = vmul.f32 %v1336_v4, %v1825_v30  ;;  %v1316_v30 = vld [vmem:[#allocation16 + $0xd8] sm:$0xff]  }
 0x2e4   :  { %v318_v9 = vmul.f32 %v1086_v6, %v310_v5 }
 0x2e5   :  { %v1338_v7 = vpop.eup %1337 }
 0x2e6   :  { %v311_v8 = vmul.f32 %v1338_v7, %v1830_v34  ;;  %v326_v12 = vadd.f32 %v1087_v10, %v318_v9  ;;  %v1320_v34 = vld [vmem:[#allocation16 + $0xe0] sm:$0xff]  }
 0x2e8   :  { %v319_v11 = vmul.f32 %v1086_v6, %v311_v8 }
 0x2ea   :  { %v327_v13 = vadd.f32 %v1087_v10, %v319_v11 }
 0x2ec   :  { %v328_v14 = vpack.c.bf16 %v327_v13, %v326_v12 }
 0x2ee   :  { %576 = vmatmul.mubr.bf16.vlgmr.msra.gmra.mrb[0].mxu1 %v328_v14  ;;  %619 = vmatmul.mubr.bf16.vlgmr.msra.gmra.mrb[4].mxu0 %v328_v14 }
 0x2ef   :  { %1163 = vmatpush3.bf16.msra.mxu1 %v1305_v18  ;;  %1185 = vmatpush3.bf16.msra.mxu0 %v1306_v19 }
 0x2f0   :  { %1164 = vmatprep.subr.bf16.mxu1 %v1307_v21  ;;  %1186 = vmatprep.subr.bf16.mxu0 %v1308_v22 }
 0x2f3   :  { %1165 = vmatpush3.bf16.msra.mxu1 %v1309_v23  ;;  %1187 = vmatpush3.bf16.msra.mxu0 %v1310_v24 }
 0x2f4   :  { %1166 = vmatprep.subr.bf16.mxu1 %v1311_v25  ;;  %1188 = vmatprep.subr.bf16.mxu0 %v1312_v26 }
 0x2f7   :  { %1167 = vmatpush3.bf16.msra.mxu1 %v1313_v27  ;;  %1189 = vmatpush3.bf16.msra.mxu0 %v1314_v28 }
 0x2f8   :  { %1168 = vmatprep.subr.bf16.mxu1 %v1315_v29  ;;  %1190 = vmatprep.subr.bf16.mxu0 %v1316_v30 }
 0x2fb   :  { %1169 = vmatpush3.bf16.msra.mxu1 %v1317_v31  ;;  %1191 = vmatpush3.bf16.msra.mxu0 %v1318_v32 }
 0x2fc   :  { %1170 = vmatprep.subr.bf16.mxu1 %v1319_v33  ;;  %1192 = vmatprep.subr.bf16.mxu0 %v1320_v34 }
 0x2ff   :  { %1171 = vmatpush3.bf16.msra.mxu1 %v1321_v35  ;;  %1193 = vmatpush3.bf16.msra.mxu0 %v1322_v36 }
 0x300   :  { %1172 = vmatprep.subr.bf16.mxu1 %v1323_v37  ;;  %1194 = vmatprep.subr.bf16.mxu0 %v1324_v38 }
 0x303   :  { %1173 = vmatpush3.bf16.msra.mxu1 %v1325_v39  ;;  %1195 = vmatpush3.bf16.msra.mxu0 %v1326_v40 }
 0x304   :  { %1174 = vmatprep.subr.bf16.mxu1 %v1327_v41  ;;  %1196 = vmatprep.subr.bf16.mxu0 %v1328_v42 }
 0x307   :  { %1175 = vmatpush3.bf16.msra.mxu1 %v1329_v43  ;;  %1197 = vmatpush3.bf16.msra.mxu0 %v1330_v44 }
 0x308   :  { %1176 = vmatprep.subr.bf16.mxu1 %v1331_v45  ;;  %1198 = vmatprep.subr.bf16.mxu0 %v1332_v46 }
 0x30b   :  { %1177 = vmatpush3.bf16.msra.mxu1 %v1333_v47  ;;  %1199 = vmatpush3.bf16.msra.mxu0 %v1334_v48 }
 0x3c1   :  { %v577_v60 = vpop.f32.mrb[0].mxu1  ;;  %v620_v61 = vpop.f32.mrb[4].mxu0 }
 0x3c2   :  { %v1836_v62 = vadd.f32 %v577_v60, %v366_v56  ;;  %v1838_v63 = vadd.f32 %v620_v61, %v374_v57  ;;  %v579_v0 = vpop.f32.mrb[1].mxu1  ;;  %v622_v1 = vpop.f32.mrb[5].mxu0 }
 0x3c3   :  { %v1840_v2 = vadd.f32 %v579_v0, %v370_v58  ;;  %v1842_v3 = vadd.f32 %v622_v1, %v378_v59  ;;  %v581_v4 = vpop.f32.mrb[2].mxu1  ;;  %v624_v5 = vpop.f32.mrb[6].mxu0 }
 0x3c4   :  { %v637_v6 = vmul.f32 0.044715, %v1836_v62  ;;  %v639_v7 = vmul.f32 0.044715, %v1838_v63  ;;  %v582_v8 = vadd.f32 %v581_v4, %v366_v56  ;;  %v625_v9 = vadd.f32 %v624_v5, %v374_v57  ;;  %v583_v10 = vpop.f32.mrb[3].mxu1  ;;  %v626_v11 = vpop.f32.mrb[7].mxu0 }
 0x3c5   :  { %v638_v12 = vmul.f32 0.044715, %v1840_v2  ;;  %v640_v13 = vmul.f32 0.044715, %v1842_v3  ;;  %v1848_v14 = vadd.f32 %v583_v10, %v370_v58  ;;  %v1850_v15 = vadd.f32 %v626_v11, %v378_v59 }
 0x3c6   :  { %v645_v17 = vmul.f32 %v637_v6, %v1836_v62  ;;  %v647_v18 = vmul.f32 %v639_v7, %v1838_v63  ;;  %v641_v19 = vmul.f32 0.044715, %v582_v8  ;;  %v643_v21 = vmul.f32 0.044715, %v625_v9 }
 0x3c7   :  { %v646_v22 = vmul.f32 %v638_v12, %v1840_v2  ;;  %v648_v23 = vmul.f32 %v640_v13, %v1842_v3  ;;  %v642_v24 = vmul.f32 0.044715, %v1848_v14  ;;  %v644_v25 = vmul.f32 0.044715, %v1850_v15 }
 0x3c8   :  { %v653_v26 = vmul.f32 %v645_v17, %v1836_v62  ;;  %v655_v27 = vmul.f32 %v647_v18, %v1838_v63  ;;  %v649_v28 = vmul.f32 %v641_v19, %v582_v8  ;;  %v651_v29 = vmul.f32 %v643_v21, %v625_v9 }
 0x3c9   :  { %v654_v30 = vmul.f32 %v646_v22, %v1840_v2  ;;  %v656_v31 = vmul.f32 %v648_v23, %v1842_v3  ;;  %v650_v32 = vmul.f32 %v642_v24, %v1848_v14  ;;  %v652_v33 = vmul.f32 %v644_v25, %v1850_v15 }
 0x3ca   :  { %v661_v34 = vadd.f32 %v653_v26, %v1836_v62  ;;  %v663_v35 = vadd.f32 %v655_v27, %v1838_v63  ;;  %v657_v36 = vmul.f32 %v649_v28, %v582_v8  ;;  %v659_v37 = vmul.f32 %v651_v29, %v625_v9 }
 0x3cb   :  { %v658_v38 = vmul.f32 %v650_v32, %v1848_v14  ;;  %v660_v39 = vmul.f32 %v652_v33, %v1850_v15  ;;  %v662_v44 = vadd.f32 %v654_v30, %v1840_v2  ;;  %v664_v48 = vadd.f32 %v656_v31, %v1842_v3  ;;  %v1120_v31 = vld [vmem:[#allocation17] ss:$0 sm:$0xff] }
 0x3cc   :  { %v669_v40 = vmul.f32 0.7978846, %v661_v34  ;;  %v671_v41 = vmul.f32 0.7978846, %v663_v35  ;;  %v665_v42 = vadd.f32 %v657_v36, %v582_v8  ;;  %v667_v43 = vadd.f32 %v659_v37, %v625_v9 }
 0x3cd   :  { %v666_v45 = vadd.f32 %v658_v38, %v1848_v14  ;;  %v670_v49 = vmul.f32 0.7978846, %v662_v44  ;;  %v668_v51 = vadd.f32 %v660_v39, %v1850_v15  ;;  %v672_v52 = vmul.f32 0.7978846, %v664_v48 }
 0x3ce   :  { %1339 = vtanh.f32 %v669_v40  ;;  %v673_v46 = vmul.f32 0.7978846, %v665_v42  ;;  %v675_v47 = vmul.f32 0.7978846, %v667_v43  ;;  %v629_v60 = vmul.f32 0.5, %v1836_v62 }
 0x3cf   :  { %1341 = vtanh.f32 %v671_v41  ;;  %v674_v50 = vmul.f32 0.7978846, %v666_v45  ;;  %v676_v53 = vmul.f32 0.7978846, %v668_v51  ;;  %v633_v61 = vmul.f32 0.5, %v582_v8 }
 0x3d0   :  { %1343 = vtanh.f32 %v673_v46  ;;  %v631_v4 = vmul.f32 0.5, %v1838_v63  ;;  %v635_v5 = vmul.f32 0.5, %v625_v9  ;;  %v630_v10 = vmul.f32 0.5, %v1840_v2 }
 0x3d1   :  { %1345 = vtanh.f32 %v675_v47  ;;  %v634_v18 = vmul.f32 0.5, %v1848_v14  ;;  %v632_v8 = vmul.f32 0.5, %v1842_v3  ;;  %v636_v23 = vmul.f32 0.5, %v1850_v15 }
 0x3d2   :  { %1347 = vtanh.f32 %v670_v49 }
 0x3d3   :  { %1349 = vtanh.f32 %v674_v50 }
 0x3d4   :  { %1351 = vtanh.f32 %v672_v52 }
 0x3d5   :  { %1353 = vtanh.f32 %v676_v53 }
 0x3d8   :  { %v1340_v54 = vpop.eup %1339 }
 0x3d9   :  { %v1342_v55 = vpop.eup %1341  ;;  %v685_v56 = vadd.f32 1.0, %v1340_v54 }
 0x3da   :  { %v1344_v57 = vpop.eup %1343  ;;  %v687_v58 = vadd.f32 1.0, %v1342_v55 }
 0x3db   :  { %v1346_v59 = vpop.eup %1345  ;;  %v689_v0 = vadd.f32 1.0, %v1344_v57  ;;  %v693_v12 = vmul.f32 %v685_v56, %v629_v60 }
 0x3dc   :  { %v1348_v1 = vpop.eup %1347  ;;  %v691_v6 = vadd.f32 1.0, %v1346_v59  ;;  %v695_v21 = vmul.f32 %v687_v58, %v631_v4 }
 0x3dd   :  { %v1350_v7 = vpop.eup %1349  ;;  %v686_v11 = vadd.f32 1.0, %v1348_v1  ;;  %v697_v13 = vmul.f32 %v689_v0, %v633_v61 }
 0x3de   :  { %v1352_v17 = vpop.eup %1351  ;;  %v690_v19 = vadd.f32 1.0, %v1350_v7  ;;  %v699_v22 = vmul.f32 %v691_v6, %v635_v5 }
 0x3df   :  { %v1354_v62 = vpop.eup %1353  ;;  %v688_v63 = vadd.f32 1.0, %v1352_v17  ;;  %v701_v9 = vpack.c.bf16 %v697_v13, %v693_v12  ;;  %v694_v24 = vmul.f32 %v686_v11, %v630_v10 }
 0x3e0   :  { %v698_v25 = vmul.f32 %v690_v19, %v634_v18  ;;  %v692_v26 = vadd.f32 1.0, %v1354_v62  ;;  %v703_v2 = vpack.c.bf16 %v699_v22, %v695_v21 }
 0x3e1   :  { %v696_v28 = vmul.f32 %v688_v63, %v632_v8 }
 0x3e2   :  { %v702_v27 = vpack.c.bf16 %v698_v25, %v694_v24  ;;  %v700_v29 = vmul.f32 %v692_v26, %v636_v23 }
 0x3e4   :  { %1000 = vmatprep.mubr.bf16.mxu1 %v702_v27  ;;  %v704_v30 = vpack.c.bf16 %v700_v29, %v696_v28 }
 0x3e5   :  { %1001 = vmatmul.mubr.bf16.vlgmr.msra.gmra.mrb[4].mxu1 %v701_v9 }
 0x3e6   :  { %1041 = vmatprep.mubr.bf16.mxu0 %v704_v30 }
 0x3e7   :  { %1042 = vmatmul.mubr.bf16.vlgmr.msra.gmra.mrb[8].mxu0 %v703_v2 }
 0x4b8   :  { %v1178_v14 = vpop.f32.mrb[4].mxu1 }
 0x4b9   :  { %v1179_v32 = vpop.f32.mrb[5].mxu1 }
 0x4ba   :  { %v1200_v3 = vpop.f32.mrb[8].mxu0  ;;  %v1180_v33 = vadd.f32 %v1179_v32, %v1178_v14  ;;  %v1181_v15 = vpop.f32.mrb[6].mxu1 }
 0x4bb   :  { %v1201_v34 = vpop.f32.mrb[9].mxu0  ;;  %v1182_v35 = vpop.f32.mrb[7].mxu1 }
 0x4bc   :  { %v1003_v36 = vadd.f32 %v1180_v33, %v1120_v31  ;;  %v1202_v37 = vadd.f32 %v1201_v34, %v1200_v3  ;;  %v1203_v38 = vpop.f32.mrb[10].mxu0  ;;  %v1183_v39 = vadd.f32 %v1182_v35, %v1181_v15 }
 0x4bd   :  { %v1204_v40 = vpop.f32.mrb[11].mxu0 }
 0x4be   :  { %v1044_v41 = vadd.f32 %v1202_v37, %v1003_v36  ;;  %v1006_v42 = vadd.f32 %v1183_v39, %v1120_v31  ;;  %v1205_v43 = vadd.f32 %v1204_v40, %v1203_v38 }
 0x4c0   :  { %v1050_v44 = vadd.f32 %v1044_v41, %v1818_v16  ;;  %v1047_v45 = vadd.f32 %v1205_v43, %v1006_v42 }
 0x4c2   :  { %1052 = vst [vmem:[#allocation19] sm:$0xff] %v1050_v44  ;;  %v1051_v46 = vadd.f32 %v1047_v45, %v1821_v20 }
 0x4c4   :  { %1053 = vst [vmem:[#allocation19 + $0x8] sm:$0xff] %v1051_v46 }
 0x4c5   :  { %1586 = shalt.err (!%p1583_p0)
}
 0x4c6   :  { %s1587_s15 = scalar_lea.hbm %s1905_s10, 256 }
 0x4c7   :  { %p1588_p1 = scmp.ne.s32.totalorder %s1905_s10, %s1587_s15  ;;  %p1591_p2 = scmp.lt.u32.totalorder %s1587_s15, %s1905_s10 }
 0x4c9   :  { %p1593_p3 = pnand %p1591_p2, %p1588_p1 }
 0x4cb   :  { %1596 = shalt.err (!%p1593_p3)
}
 0x4cc   :  { %1065 = dma.vmem_to_hbm [thread:$0]  %s1060_s24, 256, %s1905_s10, [#allocation4], %s1618_s7, %s1618_s7, %s1619_s16  }
 0x4cd   :  { %1609 = dma.done.wait [#allocation4], 256  }
 0x4ce   :  { %1610 = vsyncadd [#allocation4], 4294967040 }
 0x4cf   :  { %1069 = vsyncpa [#allocation3], 1 }
 0x4d0   :  { %1070 = vsyncpa [#allocation6], 1 }
 0x4d1   :  { %1071 = vsyncpa [#allocation9], 1 }
 0x4d2   :  { %1072 = vsyncpa [#allocation12], 1 }
 0x4d3   :  { %1073 = vsyncpa [#allocation15], 1 }
 0x4d4   :  { %1074 = vsyncpa [#allocation18], 1 }
 0x4d5   :  { %1075 = vsyncpa [#allocation4], 1 }

</bundles_post_ra>
